<compile_context>
chip_gen: v6e
topology: v6e:2x2x1
jax: 0.10.0
libtpu: 0.0.40
codegen_flags: <defaults>
</compile_context>

<pallas_src>
import math

import numpy as np
import jax
import jax.numpy as jnp
from jax import lax
from jax.experimental import pallas as pl
from jax.experimental.pallas import tpu as pltpu


def _pick_time_chunk(T):
    """Largest chunk in {16,8,4,2,1} that divides T."""
    for tc in (16, 8, 4, 2, 1):
        if T % tc == 0:
            return tc
    return 1


# ----------------------------------------------------------------------------
# Pallas kernel: one grid step == one chunk of Tc recurrent timesteps.
# ----------------------------------------------------------------------------
def _rhy_gsu_kernel(pre_ref, mask_ref, h0_ref, c0_ref, whh_ref,
                    hy_ref, cy_ref, hx_sc, cx_sc):
    @pl.when(pl.program_id(0) == 0)
    def _():
        hx_sc[...] = h0_ref[...].astype(jnp.bfloat16)
        cx_sc[...] = c0_ref[...]

    Tc = pre_ref.shape[0]
    H = cx_sc.shape[1]

    whh = whh_ref[...]            # (H, 2H) bf16, resident in VMEM for all chunks
    hx = hx_sc[...]               # (B, H) bf16 carry (spikes are exact 0/1)
    cx = cx_sc[...]               # (B, H) f32 carry

    # Statically unrolled chunk; carries live in vregs between steps.
    for i in range(Tc):
        gates = pre_ref[i] + jnp.dot(hx, whh,
                                     preferred_element_type=jnp.float32)  # (B, 2H)
        f = jax.nn.sigmoid(gates[:, :H])
        g = gates[:, H:]
        cy = f * cx + (1.0 - f) * g                       # exact PyTorch formula
        mask = jnp.broadcast_to(mask_ref[i], cy.shape)    # (1, H) -> (B, H)
        cy = jnp.where(mask == 0.0, cx, cy)               # hold cx where rhythm off
        hy = (cy >= 0.0).astype(jnp.float32) * mask       # Triangle spike (>= 0)
        hy_ref[i] = hy
        cy_ref[i] = cy
        hx = hy.astype(jnp.bfloat16)
        cx = cy

    hx_sc[...] = hx
    cx_sc[...] = cx


# ----------------------------------------------------------------------------
# Fused-sequence launcher (single pallas_call for all T steps).
# ----------------------------------------------------------------------------
@jax.jit
def _rhy_gsu_sequence(t0, x_seq, h0, c0, w_ih_t, w_hh_t, bias2d, rhy_mask_k):
    T, B, I = x_seq.shape
    H = h0.shape[1]
    Tc = _pick_time_chunk(T)

    # (1) Hoisted input projection: one big matmul, M = T*B (plain XLA).
    pre = jnp.dot(x_seq.reshape(T * B, I).astype(jnp.bfloat16), w_ih_t,
                  preferred_element_type=jnp.float32) + bias2d
    pre_gates = pre.reshape(T, B, 2 * H)

    # (2) Rhythm-mask window for [t0, t0+T): one dynamic_slice instead of
    #     T tiny scalar-prefetched per-step DMAs.
    mask_seq = lax.dynamic_slice(rhy_mask_k, (t0, 0, 0), (T, 1, H))

    grid_spec = pltpu.PrefetchScalarGridSpec(
        num_scalar_prefetch=0,
        grid=(T // Tc,),
        in_specs=[
            pl.BlockSpec((Tc, B, 2 * H), lambda t: (t, 0, 0)),   # pre-gate chunk
            pl.BlockSpec((Tc, 1, H), lambda t: (t, 0, 0)),       # mask chunk
            pl.BlockSpec((B, H), lambda t: (0, 0)),              # h0 (resident)
            pl.BlockSpec((B, H), lambda t: (0, 0)),              # c0 (resident)
            # NOTE: for large H on v7x (64 MiB VMEM), add
            # pipeline_mode=pl.Buffered(1) here to avoid double-buffering the
            # constant-index resident weight block.
            pl.BlockSpec((H, 2 * H), lambda t: (0, 0)),          # W_hh^T (resident)
        ],
        out_specs=(
            pl.BlockSpec((Tc, B, H), lambda t: (t, 0, 0)),       # hy chunk
            pl.BlockSpec((Tc, B, H), lambda t: (t, 0, 0)),       # cy chunk
        ),
        scratch_shapes=[pltpu.VMEM((B, H), jnp.bfloat16),        # hx carry
                        pltpu.VMEM((B, H), jnp.float32)],        # cx carry
    )

    # Explicit VMEM budget (resident weights + double-buffered streamed blocks).
    vmem_need = (2 * (H * 2 * H * 2 + 2 * B * H * 4)             # resident (x2 bufs)
                 + 2 * (Tc * B * 2 * H * 4 + Tc * H * 4)         # streamed inputs
                 + 2 * 2 * (Tc * B * H * 4)                      # streamed outputs
                 + B * H * (2 + 4))                              # carries
    vmem_limit = int(min(max(2 * vmem_need, 8 << 20), 32 << 20))

    flops = int(2 * T * B * H * (2 * H))                         # hx @ W_hh^T only
    transcendentals = int(T * B * H)                             # sigmoid
    bytes_accessed = int(pre_gates.size * 4 + mask_seq.size * 4
                         + w_hh_t.size * 2 + 2 * B * H * 4
                         + 2 * T * B * H * 4)

    return pl.pallas_call(
        _rhy_gsu_kernel,
        out_shape=(jax.ShapeDtypeStruct((T, B, H), jnp.float32),
                   jax.ShapeDtypeStruct((T, B, H), jnp.float32)),
        grid_spec=grid_spec,
        compiler_params=pltpu.CompilerParams(
            dimension_semantics=("arbitrary",),                  # sequential carry
            vmem_limit_bytes=vmem_limit),
        cost_estimate=pl.CostEstimate(flops=flops,
                                      transcendentals=transcendentals,
                                      bytes_accessed=bytes_accessed),
    )(pre_gates, mask_seq, h0, c0, w_hh_t)


# ----------------------------------------------------------------------------
# Rhythmic-mask precomputation (mirrors create_general_mask).
# ----------------------------------------------------------------------------
def create_general_mask(dim=128, c_min=4, c_max=8, min_dc=0.1, max_dc=0.9,
                        phase_shift_max=0.5, T=784 * 4):
    mask = []
    dc_steps = np.linspace(min_dc, max_dc, num=dim)
    cycles = np.linspace(c_min, c_max, num=dim)
    phase_shifts = np.linspace(0, int(phase_shift_max * c_max), num=dim)
    for cycle, dc, phase_shift in zip(cycles, dc_steps, phase_shifts):
        cycle = int(math.ceil(cycle))
        on_length = int(math.ceil(dc * cycle))
        off_length = cycle - on_length
        pattern = [1] * on_length + [0] * off_length
        phase_shift = int(np.round(phase_shift))      # round-half-to-even, like torch
        pattern = pattern[-phase_shift:] + pattern[:-phase_shift]
        full_pattern = pattern * (T // cycle) + pattern[: T % cycle]
        mask.append(full_pattern)
    return np.asarray(mask, dtype=np.float32)         # (dim, T)


# ----------------------------------------------------------------------------
# Module-equivalent wrapper.
# ----------------------------------------------------------------------------
class RhyGSUCellPallas:
    def __init__(self, input_size, hidden_size, key, shared_weights=False):
        self.input_size = input_size
        self.hidden_size = hidden_size
        self.shared_weights = shared_weights
        # TODO(synk): bn=True branch (nn.BatchNorm1d on cy) not implemented;
        # the reference default is bn=False.

        stdv = 1.0 / math.sqrt(hidden_size) if hidden_size > 0 else 0.0
        k_ih, k_hh, k_b = jax.random.split(key, 3)
        rows = hidden_size if shared_weights else 2 * hidden_size
        self.weight_ih = jax.random.uniform(
            k_ih, (rows, input_size), jnp.float32, minval=-stdv, maxval=stdv)
        self.weight_hh = jax.random.uniform(
            k_hh, (rows, hidden_size), jnp.float32, minval=-stdv, maxval=stdv)
        self.bias_ih = jax.random.uniform(
            k_b, (2 * hidden_size,), jnp.float32, minval=-stdv, maxval=stdv)

        # One-time, hoisted parameter prep (concat / transpose / bf16).
        if shared_weights:
            w_ih_full = jnp.concatenate([self.weight_ih, self.weight_ih], axis=0)
            w_hh_full = jnp.concatenate([self.weight_hh, self.weight_hh], axis=0)
        else:
            w_ih_full = self.weight_ih
            w_hh_full = self.weight_hh
        self.w_ih_t = jnp.asarray(w_ih_full.T, dtype=jnp.bfloat16)    # (I, 2H)
        self.w_hh_t = jnp.asarray(w_hh_full.T, dtype=jnp.bfloat16)    # (H, 2H)
        self.bias2d = self.bias_ih.reshape(1, 2 * hidden_size)        # (1, 2H)

        # Rhythm mask, pre-transposed so a time row is lane-dense:
        # kernel view is (T_total, 1, H).
        mask_th = jnp.asarray(
            create_general_mask(hidden_size, 10, 50, 0.05, 0.1, 0.5).T)
        self.rhy_mask_t = mask_th                                     # (T_total, H)
        self._rhy_mask_kernel = mask_th[:, None, :]                   # (T_total, 1, H)

    def forward_sequence(self, x_seq, state, time0):
        """x_seq: (T, B, I) f32; returns (hy_seq, cy_seq) each (T, B, H) f32."""
        hx, cx = state
        T = x_seq.shape[0]
        if isinstance(time0, (int, np.integer)):
            if time0 < 0 or time0 + T > self._rhy_mask_kernel.shape[0]:
                raise ValueError(
                    f"time0={time0} + T={T} exceeds rhythm-mask length "
                    f"{self._rhy_mask_kernel.shape[0]}")
        t0 = jnp.asarray(time0, dtype=jnp.int32)
        hy_seq, cy_seq = _rhy_gsu_sequence(
            t0, x_seq, hx, cx, self.w_ih_t, self.w_hh_t, self.bias2d,
            self._rhy_mask_kernel)
        return hy_seq, cy_seq

    def __call__(self, x, state, time):
        """Single-step API matching the PyTorch module: returns (hy, (hy, cy))."""
        hy_seq, cy_seq = self.forward_sequence(x[None], state, time)
        hy = hy_seq[0]
        return hy, (hy, cy_seq[0])


# ----------------------------------------------------------------------------
# Pure-JAX reference (mirrors the module math; same bf16 MXU inputs as kernel).
# ----------------------------------------------------------------------------
def reference_sequence(cell, x_seq, state, time0):
    hx, cx = state
    H = cell.hidden_size
    T, B, I = x_seq.shape
    pre = jnp.dot(x_seq.reshape(T * B, I).astype(jnp.bfloat16), cell.w_ih_t,
                  preferred_element_type=jnp.float32) + cell.bias2d
    pre = pre.reshape(T, B, 2 * H)
    hx = hx.astype(jnp.bfloat16)
    hy_list, cy_list = [], []
    for s in range(T):
        gates = pre[s] + jnp.dot(hx, cell.w_hh_t,
                                 preferred_element_type=jnp.float32)
        f = jax.nn.sigmoid(gates[:, :H])
        g = gates[:, H:]
        cy = f * cx + (1.0 - f) * g
        mask = jnp.broadcast_to(cell.rhy_mask_t[time0 + s][None, :], cx.shape)
        cy = jnp.where(mask == 0.0, cx, cy)
        hy = (cy >= 0.0).astype(jnp.float32) * mask
        hx = hy.astype(jnp.bfloat16)
        cx = cy
        hy_list.append(hy)
        cy_list.append(cy)
    return jnp.stack(hy_list), jnp.stack(cy_list)


if __name__ == "__main__":
    key = jax.random.PRNGKey(0)
    k_param, k_x, k_h, k_c = jax.random.split(key, 4)

    batch = 8
    input_size = 64
    hidden_size = 128
    seq_len = 32          # chunked as grid=(2,) x Tc=16
    time0 = 5

    cell = RhyGSUCellPallas(input_size, hidden_size, k_param)

    x_seq = jax.random.normal(k_x, (seq_len, batch, input_size), jnp.float32)
    hx = jax.random.normal(k_h, (batch, hidden_size), jnp.float32)
    cx = jax.random.normal(k_c, (batch, hidden_size), jnp.float32)

    # Fused sequence forward (one pallas_call over the whole sequence).
    hy_seq, cy_seq = cell.forward_sequence(x_seq, (hx, cx), time0)
    jax.block_until_ready((hy_seq, cy_seq))

    # Sanity check against the pure-JAX reference.
    hy_ref, cy_ref = reference_sequence(cell, x_seq, (hx, cx), time0)
    hy_np, cy_np = np.asarray(hy_seq), np.asarray(cy_seq)
    hy_ref_np, cy_ref_np = np.asarray(hy_ref), np.asarray(cy_ref)

    np.testing.assert_allclose(cy_np, cy_ref_np, atol=1e-2)
    # Spikes are exact 0/1; compare where the threshold is unambiguous.
    safe = np.abs(cy_ref_np) > 1e-3
    np.testing.assert_array_equal(hy_np[safe], hy_ref_np[safe])

    # Single-step API parity (module-style forward(input, state, time)).
    hy1, (hy1_state, cy1) = cell(x_seq[0], (hx, cx), time0)
    jax.block_until_ready((hy1, cy1))
    np.testing.assert_allclose(np.asarray(cy1), cy_ref_np[0], atol=1e-2)
    safe0 = np.abs(cy_ref_np[0]) > 1e-3
    np.testing.assert_array_equal(np.asarray(hy1)[safe0], hy_ref_np[0][safe0])

    print("KERNEL_OK")
</pallas_src>

<mosaic_0001>
module attributes {stable_mosaic.version = 11 : i64} {
  func.func @_rhy_gsu_kernel(%arg0: i32, %arg1: memref<16x8x256xf32, #tpu.memory_space<vmem>>, %arg2: memref<16x1x128xf32, #tpu.memory_space<vmem>>, %arg3: memref<8x128xf32, #tpu.memory_space<vmem>>, %arg4: memref<8x128xf32, #tpu.memory_space<vmem>>, %arg5: memref<128x256xbf16, #tpu.memory_space<vmem>>, %arg6: memref<16x8x128xf32, #tpu.memory_space<vmem>>, %arg7: memref<16x8x128xf32, #tpu.memory_space<vmem>>, %arg8: memref<8x128xbf16, #tpu.memory_space<vmem>>, %arg9: memref<8x128xf32, #tpu.memory_space<vmem>>) attributes {dimension_semantics = [#tpu.dimension_semantics<arbitrary>], iteration_bounds = array<i64: 2>, scalar_prefetch = 0 : i64, scratch_operands = 2 : i64, tpu.core_type = #tpu.core_type<tc>, window_params = [{transform_indices = @transform_0, window_bounds = array<i64: 16, 8, 256>}, {transform_indices = @transform_1, window_bounds = array<i64: 16, 1, 128>}, {pipeline_mode = #tpu.pipeline_mode<synchronous>, transform_indices = @transform_2, window_bounds = array<i64: 8, 128>}, {pipeline_mode = #tpu.pipeline_mode<synchronous>, transform_indices = @transform_3, window_bounds = array<i64: 8, 128>}, {pipeline_mode = #tpu.pipeline_mode<synchronous>, transform_indices = @transform_4, window_bounds = array<i64: 128, 256>}, {transform_indices = @transform_5, window_bounds = array<i64: 16, 8, 128>}, {transform_indices = @transform_6, window_bounds = array<i64: 16, 8, 128>}]} {
    %c0_i32 = arith.constant 0 : i32
    %0 = arith.cmpi eq, %arg0, %c0_i32 : i32
    %1 = arith.extui %0 : i1 to i32
    %c0_i32_0 = arith.constant 0 : i32
    %2 = arith.cmpi ne, %1, %c0_i32_0 : i32
    scf.if %2 {
      %c0_266 = arith.constant 0 : index
      %c0_267 = arith.constant 0 : index
      %568 = vector.load %arg3[%c0_266, %c0_267] : memref<8x128xf32, #tpu.memory_space<vmem>>, vector<8x128xf32>
      %569 = arith.truncf %568 : vector<8x128xf32> to vector<8x128xbf16>
      %c0_268 = arith.constant 0 : index
      %c0_269 = arith.constant 0 : index
      %570 = vector.load %arg8[%c0_268, %c0_269] : memref<8x128xbf16, #tpu.memory_space<vmem>>, vector<8x128xbf16>
      tpu.vector_store %arg8[%c0_268, %c0_269], %569 {strides = array<i32>} : memref<8x128xbf16, #tpu.memory_space<vmem>>, vector<8x128xbf16>,
      %c0_270 = arith.constant 0 : index
      %c0_271 = arith.constant 0 : index
      %571 = vector.load %arg4[%c0_270, %c0_271] : memref<8x128xf32, #tpu.memory_space<vmem>>, vector<8x128xf32>
      %c0_272 = arith.constant 0 : index
      %c0_273 = arith.constant 0 : index
      %572 = vector.load %arg9[%c0_272, %c0_273] : memref<8x128xf32, #tpu.memory_space<vmem>>, vector<8x128xf32>
      tpu.vector_store %arg9[%c0_272, %c0_273], %571 {strides = array<i32>} : memref<8x128xf32, #tpu.memory_space<vmem>>, vector<8x128xf32>,
    } else {
    }
    %c0 = arith.constant 0 : index
    %c0_1 = arith.constant 0 : index
    %3 = vector.load %arg5[%c0, %c0_1] : memref<128x256xbf16, #tpu.memory_space<vmem>>, vector<128x256xbf16>
    %c0_2 = arith.constant 0 : index
    %c0_3 = arith.constant 0 : index
    %4 = vector.load %arg8[%c0_2, %c0_3] : memref<8x128xbf16, #tpu.memory_space<vmem>>, vector<8x128xbf16>
    %c0_4 = arith.constant 0 : index
    %c0_5 = arith.constant 0 : index
    %5 = vector.load %arg9[%c0_4, %c0_5] : memref<8x128xf32, #tpu.memory_space<vmem>>, vector<8x128xf32>
    %c0_6 = arith.constant 0 : index
    %c0_7 = arith.constant 0 : index
    %c0_8 = arith.constant 0 : index
    %6 = vector.load %arg1[%c0_6, %c0_7, %c0_8] : memref<16x8x256xf32, #tpu.memory_space<vmem>>, vector<1x8x256xf32>
    %7 = vector.shape_cast %6 : vector<1x8x256xf32> to vector<8x256xf32>
    %cst = arith.constant dense<0.000000e+00> : vector<8x256xf32>
    %8 = tpu.matmul %4, %3, %cst {dimension_numbers = #tpu.dot_dimension_numbers<[1], [0], [0], [1], [0, 0, 1, 1], [], []>} : vector<8x128xbf16>, vector<128x256xbf16>, vector<8x256xf32> -> vector<8x256xf32>
    %9 = arith.addf %7, %8 : vector<8x256xf32>
    %10 = vector.extract_strided_slice %9 {offsets = [0, 0], sizes = [8, 128], strides = [1, 1]} : vector<8x256xf32> to vector<8x128xf32>
    %11 = arith.negf %10 : vector<8x128xf32>
    %12 = math.exp %11 : vector<8x128xf32>
    %cst_9 = arith.constant 1.000000e+00 : f32
    %13 = vector.broadcast %cst_9 : f32 to vector<8x128xf32>
    %14 = arith.addf %13, %12 : vector<8x128xf32>
    %15 = arith.divf %13, %14 : vector<8x128xf32>
    %16 = vector.extract_strided_slice %9 {offsets = [0, 128], sizes = [8, 128], strides = [1, 1]} : vector<8x256xf32> to vector<8x128xf32>
    %17 = arith.mulf %15, %5 : vector<8x128xf32>
    %cst_10 = arith.constant 1.000000e+00 : f32
    %18 = vector.broadcast %cst_10 : f32 to vector<8x128xf32>
    %19 = arith.subf %18, %15 : vector<8x128xf32>
    %20 = arith.mulf %19, %16 : vector<8x128xf32>
    %21 = arith.addf %17, %20 : vector<8x128xf32>
    %c0_11 = arith.constant 0 : index
    %c0_12 = arith.constant 0 : index
    %c0_13 = arith.constant 0 : index
    %22 = vector.load %arg2[%c0_11, %c0_12, %c0_13] : memref<16x1x128xf32, #tpu.memory_space<vmem>>, vector<1x1x128xf32>
    %23 = vector.shape_cast %22 : vector<1x1x128xf32> to vector<1x128xf32>
    %24 = vector.shape_cast %23 : vector<1x128xf32> to vector<1x128xf32>
    %25 = vector.broadcast %24 : vector<1x128xf32> to vector<8x128xf32>
    %cst_14 = arith.constant 0.000000e+00 : f32
    %26 = vector.broadcast %cst_14 : f32 to vector<8x128xf32>
    %27 = arith.cmpf oeq, %25, %26 : vector<8x128xf32>
    %28 = arith.select %27, %5, %21 : vector<8x128xi1>, vector<8x128xf32>
    %cst_15 = arith.constant 0.000000e+00 : f32
    %29 = vector.broadcast %cst_15 : f32 to vector<8x128xf32>
    %30 = arith.cmpf oge, %28, %29 : vector<8x128xf32>
    %31 = arith.extui %30 : vector<8x128xi1> to vector<8x128xi32>
    %32 = arith.sitofp %31 : vector<8x128xi32> to vector<8x128xf32>
    %33 = arith.mulf %32, %25 : vector<8x128xf32>
    %c0_16 = arith.constant 0 : index
    %c0_17 = arith.constant 0 : index
    %c0_18 = arith.constant 0 : index
    %34 = vector.load %arg6[%c0_16, %c0_17, %c0_18] : memref<16x8x128xf32, #tpu.memory_space<vmem>>, vector<1x8x128xf32>
    %35 = vector.shape_cast %34 : vector<1x8x128xf32> to vector<8x128xf32>
    %36 = vector.shape_cast %33 : vector<8x128xf32> to vector<1x8x128xf32>
    tpu.vector_store %arg6[%c0_16, %c0_17, %c0_18], %36 {strides = array<i32>} : memref<16x8x128xf32, #tpu.memory_space<vmem>>, vector<1x8x128xf32>,
    %c0_19 = arith.constant 0 : index
    %c0_20 = arith.constant 0 : index
    %c0_21 = arith.constant 0 : index
    %37 = vector.load %arg7[%c0_19, %c0_20, %c0_21] : memref<16x8x128xf32, #tpu.memory_space<vmem>>, vector<1x8x128xf32>
    %38 = vector.shape_cast %37 : vector<1x8x128xf32> to vector<8x128xf32>
    %39 = vector.shape_cast %28 : vector<8x128xf32> to vector<1x8x128xf32>
    tpu.vector_store %arg7[%c0_19, %c0_20, %c0_21], %39 {strides = array<i32>} : memref<16x8x128xf32, #tpu.memory_space<vmem>>, vector<1x8x128xf32>,
    %40 = arith.truncf %33 : vector<8x128xf32> to vector<8x128xbf16>
    %c1 = arith.constant 1 : index
    %c0_22 = arith.constant 0 : index
    %c0_23 = arith.constant 0 : index
    %41 = vector.load %arg1[%c1, %c0_22, %c0_23] : memref<16x8x256xf32, #tpu.memory_space<vmem>>, vector<1x8x256xf32>
    %42 = vector.shape_cast %41 : vector<1x8x256xf32> to vector<8x256xf32>
    %cst_24 = arith.constant dense<0.000000e+00> : vector<8x256xf32>
    %43 = tpu.matmul %40, %3, %cst_24 {dimension_numbers = #tpu.dot_dimension_numbers<[1], [0], [0], [1], [0, 0, 1, 1], [], []>} : vector<8x128xbf16>, vector<128x256xbf16>, vector<8x256xf32> -> vector<8x256xf32>
    %44 = arith.addf %42, %43 : vector<8x256xf32>
    %45 = vector.extract_strided_slice %44 {offsets = [0, 0], sizes = [8, 128], strides = [1, 1]} : vector<8x256xf32> to vector<8x128xf32>
    %46 = arith.negf %45 : vector<8x128xf32>
    %47 = math.exp %46 : vector<8x128xf32>
    %cst_25 = arith.constant 1.000000e+00 : f32
    %48 = vector.broadcast %cst_25 : f32 to vector<8x128xf32>
    %49 = arith.addf %48, %47 : vector<8x128xf32>
    %50 = arith.divf %48, %49 : vector<8x128xf32>
    %51 = vector.extract_strided_slice %44 {offsets = [0, 128], sizes = [8, 128], strides = [1, 1]} : vector<8x256xf32> to vector<8x128xf32>
    %52 = arith.mulf %50, %28 : vector<8x128xf32>
    %cst_26 = arith.constant 1.000000e+00 : f32
    %53 = vector.broadcast %cst_26 : f32 to vector<8x128xf32>
    %54 = arith.subf %53, %50 : vector<8x128xf32>
    %55 = arith.mulf %54, %51 : vector<8x128xf32>
    %56 = arith.addf %52, %55 : vector<8x128xf32>
    %c1_27 = arith.constant 1 : index
    %c0_28 = arith.constant 0 : index
    %c0_29 = arith.constant 0 : index
    %57 = vector.load %arg2[%c1_27, %c0_28, %c0_29] : memref<16x1x128xf32, #tpu.memory_space<vmem>>, vector<1x1x128xf32>
    %58 = vector.shape_cast %57 : vector<1x1x128xf32> to vector<1x128xf32>
    %59 = vector.shape_cast %58 : vector<1x128xf32> to vector<1x128xf32>
    %60 = vector.broadcast %59 : vector<1x128xf32> to vector<8x128xf32>
    %cst_30 = arith.constant 0.000000e+00 : f32
    %61 = vector.broadcast %cst_30 : f32 to vector<8x128xf32>
    %62 = arith.cmpf oeq, %60, %61 : vector<8x128xf32>
    %63 = arith.select %62, %28, %56 : vector<8x128xi1>, vector<8x128xf32>
    %cst_31 = arith.constant 0.000000e+00 : f32
    %64 = vector.broadcast %cst_31 : f32 to vector<8x128xf32>
    %65 = arith.cmpf oge, %63, %64 : vector<8x128xf32>
    %66 = arith.extui %65 : vector<8x128xi1> to vector<8x128xi32>
    %67 = arith.sitofp %66 : vector<8x128xi32> to vector<8x128xf32>
    %68 = arith.mulf %67, %60 : vector<8x128xf32>
    %c1_32 = arith.constant 1 : index
    %c0_33 = arith.constant 0 : index
    %c0_34 = arith.constant 0 : index
    %69 = vector.load %arg6[%c1_32, %c0_33, %c0_34] : memref<16x8x128xf32, #tpu.memory_space<vmem>>, vector<1x8x128xf32>
    %70 = vector.shape_cast %69 : vector<1x8x128xf32> to vector<8x128xf32>
    %71 = vector.shape_cast %68 : vector<8x128xf32> to vector<1x8x128xf32>
    tpu.vector_store %arg6[%c1_32, %c0_33, %c0_34], %71 {strides = array<i32>} : memref<16x8x128xf32, #tpu.memory_space<vmem>>, vector<1x8x128xf32>,
    %c1_35 = arith.constant 1 : index
    %c0_36 = arith.constant 0 : index
    %c0_37 = arith.constant 0 : index
    %72 = vector.load %arg7[%c1_35, %c0_36, %c0_37] : memref<16x8x128xf32, #tpu.memory_space<vmem>>, vector<1x8x128xf32>
    %73 = vector.shape_cast %72 : vector<1x8x128xf32> to vector<8x128xf32>
    %74 = vector.shape_cast %63 : vector<8x128xf32> to vector<1x8x128xf32>
    tpu.vector_store %arg7[%c1_35, %c0_36, %c0_37], %74 {strides = array<i32>} : memref<16x8x128xf32, #tpu.memory_space<vmem>>, vector<1x8x128xf32>,
    %75 = arith.truncf %68 : vector<8x128xf32> to vector<8x128xbf16>
    %c2 = arith.constant 2 : index
    %c0_38 = arith.constant 0 : index
    %c0_39 = arith.constant 0 : index
    %76 = vector.load %arg1[%c2, %c0_38, %c0_39] : memref<16x8x256xf32, #tpu.memory_space<vmem>>, vector<1x8x256xf32>
    %77 = vector.shape_cast %76 : vector<1x8x256xf32> to vector<8x256xf32>
    %cst_40 = arith.constant dense<0.000000e+00> : vector<8x256xf32>
    %78 = tpu.matmul %75, %3, %cst_40 {dimension_numbers = #tpu.dot_dimension_numbers<[1], [0], [0], [1], [0, 0, 1, 1], [], []>} : vector<8x128xbf16>, vector<128x256xbf16>, vector<8x256xf32> -> vector<8x256xf32>
    %79 = arith.addf %77, %78 : vector<8x256xf32>
    %80 = vector.extract_strided_slice %79 {offsets = [0, 0], sizes = [8, 128], strides = [1, 1]} : vector<8x256xf32> to vector<8x128xf32>
    %81 = arith.negf %80 : vector<8x128xf32>
    %82 = math.exp %81 : vector<8x128xf32>
    %cst_41 = arith.constant 1.000000e+00 : f32
    %83 = vector.broadcast %cst_41 : f32 to vector<8x128xf32>
    %84 = arith.addf %83, %82 : vector<8x128xf32>
    %85 = arith.divf %83, %84 : vector<8x128xf32>
    %86 = vector.extract_strided_slice %79 {offsets = [0, 128], sizes = [8, 128], strides = [1, 1]} : vector<8x256xf32> to vector<8x128xf32>
    %87 = arith.mulf %85, %63 : vector<8x128xf32>
    %cst_42 = arith.constant 1.000000e+00 : f32
    %88 = vector.broadcast %cst_42 : f32 to vector<8x128xf32>
    %89 = arith.subf %88, %85 : vector<8x128xf32>
    %90 = arith.mulf %89, %86 : vector<8x128xf32>
    %91 = arith.addf %87, %90 : vector<8x128xf32>
    %c2_43 = arith.constant 2 : index
    %c0_44 = arith.constant 0 : index
    %c0_45 = arith.constant 0 : index
    %92 = vector.load %arg2[%c2_43, %c0_44, %c0_45] : memref<16x1x128xf32, #tpu.memory_space<vmem>>, vector<1x1x128xf32>
    %93 = vector.shape_cast %92 : vector<1x1x128xf32> to vector<1x128xf32>
    %94 = vector.shape_cast %93 : vector<1x128xf32> to vector<1x128xf32>
    %95 = vector.broadcast %94 : vector<1x128xf32> to vector<8x128xf32>
    %cst_46 = arith.constant 0.000000e+00 : f32
    %96 = vector.broadcast %cst_46 : f32 to vector<8x128xf32>
    %97 = arith.cmpf oeq, %95, %96 : vector<8x128xf32>
    %98 = arith.select %97, %63, %91 : vector<8x128xi1>, vector<8x128xf32>
    %cst_47 = arith.constant 0.000000e+00 : f32
    %99 = vector.broadcast %cst_47 : f32 to vector<8x128xf32>
    %100 = arith.cmpf oge, %98, %99 : vector<8x128xf32>
    %101 = arith.extui %100 : vector<8x128xi1> to vector<8x128xi32>
    %102 = arith.sitofp %101 : vector<8x128xi32> to vector<8x128xf32>
    %103 = arith.mulf %102, %95 : vector<8x128xf32>
    %c2_48 = arith.constant 2 : index
    %c0_49 = arith.constant 0 : index
    %c0_50 = arith.constant 0 : index
    %104 = vector.load %arg6[%c2_48, %c0_49, %c0_50] : memref<16x8x128xf32, #tpu.memory_space<vmem>>, vector<1x8x128xf32>
    %105 = vector.shape_cast %104 : vector<1x8x128xf32> to vector<8x128xf32>
    %106 = vector.shape_cast %103 : vector<8x128xf32> to vector<1x8x128xf32>
    tpu.vector_store %arg6[%c2_48, %c0_49, %c0_50], %106 {strides = array<i32>} : memref<16x8x128xf32, #tpu.memory_space<vmem>>, vector<1x8x128xf32>,
    %c2_51 = arith.constant 2 : index
    %c0_52 = arith.constant 0 : index
    %c0_53 = arith.constant 0 : index
    %107 = vector.load %arg7[%c2_51, %c0_52, %c0_53] : memref<16x8x128xf32, #tpu.memory_space<vmem>>, vector<1x8x128xf32>
    %108 = vector.shape_cast %107 : vector<1x8x128xf32> to vector<8x128xf32>
    %109 = vector.shape_cast %98 : vector<8x128xf32> to vector<1x8x128xf32>
    tpu.vector_store %arg7[%c2_51, %c0_52, %c0_53], %109 {strides = array<i32>} : memref<16x8x128xf32, #tpu.memory_space<vmem>>, vector<1x8x128xf32>,
    %110 = arith.truncf %103 : vector<8x128xf32> to vector<8x128xbf16>
    %c3 = arith.constant 3 : index
    %c0_54 = arith.constant 0 : index
    %c0_55 = arith.constant 0 : index
    %111 = vector.load %arg1[%c3, %c0_54, %c0_55] : memref<16x8x256xf32, #tpu.memory_space<vmem>>, vector<1x8x256xf32>
    %112 = vector.shape_cast %111 : vector<1x8x256xf32> to vector<8x256xf32>
    %cst_56 = arith.constant dense<0.000000e+00> : vector<8x256xf32>
    %113 = tpu.matmul %110, %3, %cst_56 {dimension_numbers = #tpu.dot_dimension_numbers<[1], [0], [0], [1], [0, 0, 1, 1], [], []>} : vector<8x128xbf16>, vector<128x256xbf16>, vector<8x256xf32> -> vector<8x256xf32>
    %114 = arith.addf %112, %113 : vector<8x256xf32>
    %115 = vector.extract_strided_slice %114 {offsets = [0, 0], sizes = [8, 128], strides = [1, 1]} : vector<8x256xf32> to vector<8x128xf32>
    %116 = arith.negf %115 : vector<8x128xf32>
    %117 = math.exp %116 : vector<8x128xf32>
    %cst_57 = arith.constant 1.000000e+00 : f32
    %118 = vector.broadcast %cst_57 : f32 to vector<8x128xf32>
    %119 = arith.addf %118, %117 : vector<8x128xf32>
    %120 = arith.divf %118, %119 : vector<8x128xf32>
    %121 = vector.extract_strided_slice %114 {offsets = [0, 128], sizes = [8, 128], strides = [1, 1]} : vector<8x256xf32> to vector<8x128xf32>
    %122 = arith.mulf %120, %98 : vector<8x128xf32>
    %cst_58 = arith.constant 1.000000e+00 : f32
    %123 = vector.broadcast %cst_58 : f32 to vector<8x128xf32>
    %124 = arith.subf %123, %120 : vector<8x128xf32>
    %125 = arith.mulf %124, %121 : vector<8x128xf32>
    %126 = arith.addf %122, %125 : vector<8x128xf32>
    %c3_59 = arith.constant 3 : index
    %c0_60 = arith.constant 0 : index
    %c0_61 = arith.constant 0 : index
    %127 = vector.load %arg2[%c3_59, %c0_60, %c0_61] : memref<16x1x128xf32, #tpu.memory_space<vmem>>, vector<1x1x128xf32>
    %128 = vector.shape_cast %127 : vector<1x1x128xf32> to vector<1x128xf32>
    %129 = vector.shape_cast %128 : vector<1x128xf32> to vector<1x128xf32>
    %130 = vector.broadcast %129 : vector<1x128xf32> to vector<8x128xf32>
    %cst_62 = arith.constant 0.000000e+00 : f32
    %131 = vector.broadcast %cst_62 : f32 to vector<8x128xf32>
    %132 = arith.cmpf oeq, %130, %131 : vector<8x128xf32>
    %133 = arith.select %132, %98, %126 : vector<8x128xi1>, vector<8x128xf32>
    %cst_63 = arith.constant 0.000000e+00 : f32
    %134 = vector.broadcast %cst_63 : f32 to vector<8x128xf32>
    %135 = arith.cmpf oge, %133, %134 : vector<8x128xf32>
    %136 = arith.extui %135 : vector<8x128xi1> to vector<8x128xi32>
    %137 = arith.sitofp %136 : vector<8x128xi32> to vector<8x128xf32>
    %138 = arith.mulf %137, %130 : vector<8x128xf32>
    %c3_64 = arith.constant 3 : index
    %c0_65 = arith.constant 0 : index
    %c0_66 = arith.constant 0 : index
    %139 = vector.load %arg6[%c3_64, %c0_65, %c0_66] : memref<16x8x128xf32, #tpu.memory_space<vmem>>, vector<1x8x128xf32>
    %140 = vector.shape_cast %139 : vector<1x8x128xf32> to vector<8x128xf32>
    %141 = vector.shape_cast %138 : vector<8x128xf32> to vector<1x8x128xf32>
    tpu.vector_store %arg6[%c3_64, %c0_65, %c0_66], %141 {strides = array<i32>} : memref<16x8x128xf32, #tpu.memory_space<vmem>>, vector<1x8x128xf32>,
    %c3_67 = arith.constant 3 : index
    %c0_68 = arith.constant 0 : index
    %c0_69 = arith.constant 0 : index
    %142 = vector.load %arg7[%c3_67, %c0_68, %c0_69] : memref<16x8x128xf32, #tpu.memory_space<vmem>>, vector<1x8x128xf32>
    %143 = vector.shape_cast %142 : vector<1x8x128xf32> to vector<8x128xf32>
    %144 = vector.shape_cast %133 : vector<8x128xf32> to vector<1x8x128xf32>
    tpu.vector_store %arg7[%c3_67, %c0_68, %c0_69], %144 {strides = array<i32>} : memref<16x8x128xf32, #tpu.memory_space<vmem>>, vector<1x8x128xf32>,
    %145 = arith.truncf %138 : vector<8x128xf32> to vector<8x128xbf16>
    %c4 = arith.constant 4 : index
    %c0_70 = arith.constant 0 : index
    %c0_71 = arith.constant 0 : index
    %146 = vector.load %arg1[%c4, %c0_70, %c0_71] : memref<16x8x256xf32, #tpu.memory_space<vmem>>, vector<1x8x256xf32>
    %147 = vector.shape_cast %146 : vector<1x8x256xf32> to vector<8x256xf32>
    %cst_72 = arith.constant dense<0.000000e+00> : vector<8x256xf32>
    %148 = tpu.matmul %145, %3, %cst_72 {dimension_numbers = #tpu.dot_dimension_numbers<[1], [0], [0], [1], [0, 0, 1, 1], [], []>} : vector<8x128xbf16>, vector<128x256xbf16>, vector<8x256xf32> -> vector<8x256xf32>
    %149 = arith.addf %147, %148 : vector<8x256xf32>
    %150 = vector.extract_strided_slice %149 {offsets = [0, 0], sizes = [8, 128], strides = [1, 1]} : vector<8x256xf32> to vector<8x128xf32>
    %151 = arith.negf %150 : vector<8x128xf32>
    %152 = math.exp %151 : vector<8x128xf32>
    %cst_73 = arith.constant 1.000000e+00 : f32
    %153 = vector.broadcast %cst_73 : f32 to vector<8x128xf32>
    %154 = arith.addf %153, %152 : vector<8x128xf32>
    %155 = arith.divf %153, %154 : vector<8x128xf32>
    %156 = vector.extract_strided_slice %149 {offsets = [0, 128], sizes = [8, 128], strides = [1, 1]} : vector<8x256xf32> to vector<8x128xf32>
    %157 = arith.mulf %155, %133 : vector<8x128xf32>
    %cst_74 = arith.constant 1.000000e+00 : f32
    %158 = vector.broadcast %cst_74 : f32 to vector<8x128xf32>
    %159 = arith.subf %158, %155 : vector<8x128xf32>
    %160 = arith.mulf %159, %156 : vector<8x128xf32>
    %161 = arith.addf %157, %160 : vector<8x128xf32>
    %c4_75 = arith.constant 4 : index
    %c0_76 = arith.constant 0 : index
    %c0_77 = arith.constant 0 : index
    %162 = vector.load %arg2[%c4_75, %c0_76, %c0_77] : memref<16x1x128xf32, #tpu.memory_space<vmem>>, vector<1x1x128xf32>
    %163 = vector.shape_cast %162 : vector<1x1x128xf32> to vector<1x128xf32>
    %164 = vector.shape_cast %163 : vector<1x128xf32> to vector<1x128xf32>
    %165 = vector.broadcast %164 : vector<1x128xf32> to vector<8x128xf32>
    %cst_78 = arith.constant 0.000000e+00 : f32
    %166 = vector.broadcast %cst_78 : f32 to vector<8x128xf32>
    %167 = arith.cmpf oeq, %165, %166 : vector<8x128xf32>
    %168 = arith.select %167, %133, %161 : vector<8x128xi1>, vector<8x128xf32>
    %cst_79 = arith.constant 0.000000e+00 : f32
    %169 = vector.broadcast %cst_79 : f32 to vector<8x128xf32>
    %170 = arith.cmpf oge, %168, %169 : vector<8x128xf32>
    %171 = arith.extui %170 : vector<8x128xi1> to vector<8x128xi32>
    %172 = arith.sitofp %171 : vector<8x128xi32> to vector<8x128xf32>
    %173 = arith.mulf %172, %165 : vector<8x128xf32>
    %c4_80 = arith.constant 4 : index
    %c0_81 = arith.constant 0 : index
    %c0_82 = arith.constant 0 : index
    %174 = vector.load %arg6[%c4_80, %c0_81, %c0_82] : memref<16x8x128xf32, #tpu.memory_space<vmem>>, vector<1x8x128xf32>
    %175 = vector.shape_cast %174 : vector<1x8x128xf32> to vector<8x128xf32>
    %176 = vector.shape_cast %173 : vector<8x128xf32> to vector<1x8x128xf32>
    tpu.vector_store %arg6[%c4_80, %c0_81, %c0_82], %176 {strides = array<i32>} : memref<16x8x128xf32, #tpu.memory_space<vmem>>, vector<1x8x128xf32>,
    %c4_83 = arith.constant 4 : index
    %c0_84 = arith.constant 0 : index
    %c0_85 = arith.constant 0 : index
    %177 = vector.load %arg7[%c4_83, %c0_84, %c0_85] : memref<16x8x128xf32, #tpu.memory_space<vmem>>, vector<1x8x128xf32>
    %178 = vector.shape_cast %177 : vector<1x8x128xf32> to vector<8x128xf32>
    %179 = vector.shape_cast %168 : vector<8x128xf32> to vector<1x8x128xf32>
    tpu.vector_store %arg7[%c4_83, %c0_84, %c0_85], %179 {strides = array<i32>} : memref<16x8x128xf32, #tpu.memory_space<vmem>>, vector<1x8x128xf32>,
    %180 = arith.truncf %173 : vector<8x128xf32> to vector<8x128xbf16>
    %c5 = arith.constant 5 : index
    %c0_86 = arith.constant 0 : index
    %c0_87 = arith.constant 0 : index
    %181 = vector.load %arg1[%c5, %c0_86, %c0_87] : memref<16x8x256xf32, #tpu.memory_space<vmem>>, vector<1x8x256xf32>
    %182 = vector.shape_cast %181 : vector<1x8x256xf32> to vector<8x256xf32>
    %cst_88 = arith.constant dense<0.000000e+00> : vector<8x256xf32>
    %183 = tpu.matmul %180, %3, %cst_88 {dimension_numbers = #tpu.dot_dimension_numbers<[1], [0], [0], [1], [0, 0, 1, 1], [], []>} : vector<8x128xbf16>, vector<128x256xbf16>, vector<8x256xf32> -> vector<8x256xf32>
    %184 = arith.addf %182, %183 : vector<8x256xf32>
    %185 = vector.extract_strided_slice %184 {offsets = [0, 0], sizes = [8, 128], strides = [1, 1]} : vector<8x256xf32> to vector<8x128xf32>
    %186 = arith.negf %185 : vector<8x128xf32>
    %187 = math.exp %186 : vector<8x128xf32>
    %cst_89 = arith.constant 1.000000e+00 : f32
    %188 = vector.broadcast %cst_89 : f32 to vector<8x128xf32>
    %189 = arith.addf %188, %187 : vector<8x128xf32>
    %190 = arith.divf %188, %189 : vector<8x128xf32>
    %191 = vector.extract_strided_slice %184 {offsets = [0, 128], sizes = [8, 128], strides = [1, 1]} : vector<8x256xf32> to vector<8x128xf32>
    %192 = arith.mulf %190, %168 : vector<8x128xf32>
    %cst_90 = arith.constant 1.000000e+00 : f32
    %193 = vector.broadcast %cst_90 : f32 to vector<8x128xf32>
    %194 = arith.subf %193, %190 : vector<8x128xf32>
    %195 = arith.mulf %194, %191 : vector<8x128xf32>
    %196 = arith.addf %192, %195 : vector<8x128xf32>
    %c5_91 = arith.constant 5 : index
    %c0_92 = arith.constant 0 : index
    %c0_93 = arith.constant 0 : index
    %197 = vector.load %arg2[%c5_91, %c0_92, %c0_93] : memref<16x1x128xf32, #tpu.memory_space<vmem>>, vector<1x1x128xf32>
    %198 = vector.shape_cast %197 : vector<1x1x128xf32> to vector<1x128xf32>
    %199 = vector.shape_cast %198 : vector<1x128xf32> to vector<1x128xf32>
    %200 = vector.broadcast %199 : vector<1x128xf32> to vector<8x128xf32>
    %cst_94 = arith.constant 0.000000e+00 : f32
    %201 = vector.broadcast %cst_94 : f32 to vector<8x128xf32>
    %202 = arith.cmpf oeq, %200, %201 : vector<8x128xf32>
    %203 = arith.select %202, %168, %196 : vector<8x128xi1>, vector<8x128xf32>
    %cst_95 = arith.constant 0.000000e+00 : f32
    %204 = vector.broadcast %cst_95 : f32 to vector<8x128xf32>
    %205 = arith.cmpf oge, %203, %204 : vector<8x128xf32>
    %206 = arith.extui %205 : vector<8x128xi1> to vector<8x128xi32>
    %207 = arith.sitofp %206 : vector<8x128xi32> to vector<8x128xf32>
    %208 = arith.mulf %207, %200 : vector<8x128xf32>
    %c5_96 = arith.constant 5 : index
    %c0_97 = arith.constant 0 : index
    %c0_98 = arith.constant 0 : index
    %209 = vector.load %arg6[%c5_96, %c0_97, %c0_98] : memref<16x8x128xf32, #tpu.memory_space<vmem>>, vector<1x8x128xf32>
    %210 = vector.shape_cast %209 : vector<1x8x128xf32> to vector<8x128xf32>
    %211 = vector.shape_cast %208 : vector<8x128xf32> to vector<1x8x128xf32>
    tpu.vector_store %arg6[%c5_96, %c0_97, %c0_98], %211 {strides = array<i32>} : memref<16x8x128xf32, #tpu.memory_space<vmem>>, vector<1x8x128xf32>,
    %c5_99 = arith.constant 5 : index
    %c0_100 = arith.constant 0 : index
    %c0_101 = arith.constant 0 : index
    %212 = vector.load %arg7[%c5_99, %c0_100, %c0_101] : memref<16x8x128xf32, #tpu.memory_space<vmem>>, vector<1x8x128xf32>
    %213 = vector.shape_cast %212 : vector<1x8x128xf32> to vector<8x128xf32>
    %214 = vector.shape_cast %203 : vector<8x128xf32> to vector<1x8x128xf32>
    tpu.vector_store %arg7[%c5_99, %c0_100, %c0_101], %214 {strides = array<i32>} : memref<16x8x128xf32, #tpu.memory_space<vmem>>, vector<1x8x128xf32>,
    %215 = arith.truncf %208 : vector<8x128xf32> to vector<8x128xbf16>
    %c6 = arith.constant 6 : index
    %c0_102 = arith.constant 0 : index
    %c0_103 = arith.constant 0 : index
    %216 = vector.load %arg1[%c6, %c0_102, %c0_103] : memref<16x8x256xf32, #tpu.memory_space<vmem>>, vector<1x8x256xf32>
    %217 = vector.shape_cast %216 : vector<1x8x256xf32> to vector<8x256xf32>
    %cst_104 = arith.constant dense<0.000000e+00> : vector<8x256xf32>
    %218 = tpu.matmul %215, %3, %cst_104 {dimension_numbers = #tpu.dot_dimension_numbers<[1], [0], [0], [1], [0, 0, 1, 1], [], []>} : vector<8x128xbf16>, vector<128x256xbf16>, vector<8x256xf32> -> vector<8x256xf32>
    %219 = arith.addf %217, %218 : vector<8x256xf32>
    %220 = vector.extract_strided_slice %219 {offsets = [0, 0], sizes = [8, 128], strides = [1, 1]} : vector<8x256xf32> to vector<8x128xf32>
    %221 = arith.negf %220 : vector<8x128xf32>
    %222 = math.exp %221 : vector<8x128xf32>
    %cst_105 = arith.constant 1.000000e+00 : f32
    %223 = vector.broadcast %cst_105 : f32 to vector<8x128xf32>
    %224 = arith.addf %223, %222 : vector<8x128xf32>
    %225 = arith.divf %223, %224 : vector<8x128xf32>
    %226 = vector.extract_strided_slice %219 {offsets = [0, 128], sizes = [8, 128], strides = [1, 1]} : vector<8x256xf32> to vector<8x128xf32>
    %227 = arith.mulf %225, %203 : vector<8x128xf32>
    %cst_106 = arith.constant 1.000000e+00 : f32
    %228 = vector.broadcast %cst_106 : f32 to vector<8x128xf32>
    %229 = arith.subf %228, %225 : vector<8x128xf32>
    %230 = arith.mulf %229, %226 : vector<8x128xf32>
    %231 = arith.addf %227, %230 : vector<8x128xf32>
    %c6_107 = arith.constant 6 : index
    %c0_108 = arith.constant 0 : index
    %c0_109 = arith.constant 0 : index
    %232 = vector.load %arg2[%c6_107, %c0_108, %c0_109] : memref<16x1x128xf32, #tpu.memory_space<vmem>>, vector<1x1x128xf32>
    %233 = vector.shape_cast %232 : vector<1x1x128xf32> to vector<1x128xf32>
    %234 = vector.shape_cast %233 : vector<1x128xf32> to vector<1x128xf32>
    %235 = vector.broadcast %234 : vector<1x128xf32> to vector<8x128xf32>
    %cst_110 = arith.constant 0.000000e+00 : f32
    %236 = vector.broadcast %cst_110 : f32 to vector<8x128xf32>
    %237 = arith.cmpf oeq, %235, %236 : vector<8x128xf32>
    %238 = arith.select %237, %203, %231 : vector<8x128xi1>, vector<8x128xf32>
    %cst_111 = arith.constant 0.000000e+00 : f32
    %239 = vector.broadcast %cst_111 : f32 to vector<8x128xf32>
    %240 = arith.cmpf oge, %238, %239 : vector<8x128xf32>
    %241 = arith.extui %240 : vector<8x128xi1> to vector<8x128xi32>
    %242 = arith.sitofp %241 : vector<8x128xi32> to vector<8x128xf32>
    %243 = arith.mulf %242, %235 : vector<8x128xf32>
    %c6_112 = arith.constant 6 : index
    %c0_113 = arith.constant 0 : index
    %c0_114 = arith.constant 0 : index
    %244 = vector.load %arg6[%c6_112, %c0_113, %c0_114] : memref<16x8x128xf32, #tpu.memory_space<vmem>>, vector<1x8x128xf32>
    %245 = vector.shape_cast %244 : vector<1x8x128xf32> to vector<8x128xf32>
    %246 = vector.shape_cast %243 : vector<8x128xf32> to vector<1x8x128xf32>
    tpu.vector_store %arg6[%c6_112, %c0_113, %c0_114], %246 {strides = array<i32>} : memref<16x8x128xf32, #tpu.memory_space<vmem>>, vector<1x8x128xf32>,
    %c6_115 = arith.constant 6 : index
    %c0_116 = arith.constant 0 : index
    %c0_117 = arith.constant 0 : index
    %247 = vector.load %arg7[%c6_115, %c0_116, %c0_117] : memref<16x8x128xf32, #tpu.memory_space<vmem>>, vector<1x8x128xf32>
    %248 = vector.shape_cast %247 : vector<1x8x128xf32> to vector<8x128xf32>
    %249 = vector.shape_cast %238 : vector<8x128xf32> to vector<1x8x128xf32>
    tpu.vector_store %arg7[%c6_115, %c0_116, %c0_117], %249 {strides = array<i32>} : memref<16x8x128xf32, #tpu.memory_space<vmem>>, vector<1x8x128xf32>,
    %250 = arith.truncf %243 : vector<8x128xf32> to vector<8x128xbf16>
    %c7 = arith.constant 7 : index
    %c0_118 = arith.constant 0 : index
    %c0_119 = arith.constant 0 : index
    %251 = vector.load %arg1[%c7, %c0_118, %c0_119] : memref<16x8x256xf32, #tpu.memory_space<vmem>>, vector<1x8x256xf32>
    %252 = vector.shape_cast %251 : vector<1x8x256xf32> to vector<8x256xf32>
    %cst_120 = arith.constant dense<0.000000e+00> : vector<8x256xf32>
    %253 = tpu.matmul %250, %3, %cst_120 {dimension_numbers = #tpu.dot_dimension_numbers<[1], [0], [0], [1], [0, 0, 1, 1], [], []>} : vector<8x128xbf16>, vector<128x256xbf16>, vector<8x256xf32> -> vector<8x256xf32>
    %254 = arith.addf %252, %253 : vector<8x256xf32>
    %255 = vector.extract_strided_slice %254 {offsets = [0, 0], sizes = [8, 128], strides = [1, 1]} : vector<8x256xf32> to vector<8x128xf32>
    %256 = arith.negf %255 : vector<8x128xf32>
    %257 = math.exp %256 : vector<8x128xf32>
    %cst_121 = arith.constant 1.000000e+00 : f32
    %258 = vector.broadcast %cst_121 : f32 to vector<8x128xf32>
    %259 = arith.addf %258, %257 : vector<8x128xf32>
    %260 = arith.divf %258, %259 : vector<8x128xf32>
    %261 = vector.extract_strided_slice %254 {offsets = [0, 128], sizes = [8, 128], strides = [1, 1]} : vector<8x256xf32> to vector<8x128xf32>
    %262 = arith.mulf %260, %238 : vector<8x128xf32>
    %cst_122 = arith.constant 1.000000e+00 : f32
    %263 = vector.broadcast %cst_122 : f32 to vector<8x128xf32>
    %264 = arith.subf %263, %260 : vector<8x128xf32>
    %265 = arith.mulf %264, %261 : vector<8x128xf32>
    %266 = arith.addf %262, %265 : vector<8x128xf32>
    %c7_123 = arith.constant 7 : index
    %c0_124 = arith.constant 0 : index
    %c0_125 = arith.constant 0 : index
    %267 = vector.load %arg2[%c7_123, %c0_124, %c0_125] : memref<16x1x128xf32, #tpu.memory_space<vmem>>, vector<1x1x128xf32>
    %268 = vector.shape_cast %267 : vector<1x1x128xf32> to vector<1x128xf32>
    %269 = vector.shape_cast %268 : vector<1x128xf32> to vector<1x128xf32>
    %270 = vector.broadcast %269 : vector<1x128xf32> to vector<8x128xf32>
    %cst_126 = arith.constant 0.000000e+00 : f32
    %271 = vector.broadcast %cst_126 : f32 to vector<8x128xf32>
    %272 = arith.cmpf oeq, %270, %271 : vector<8x128xf32>
    %273 = arith.select %272, %238, %266 : vector<8x128xi1>, vector<8x128xf32>
    %cst_127 = arith.constant 0.000000e+00 : f32
    %274 = vector.broadcast %cst_127 : f32 to vector<8x128xf32>
    %275 = arith.cmpf oge, %273, %274 : vector<8x128xf32>
    %276 = arith.extui %275 : vector<8x128xi1> to vector<8x128xi32>
    %277 = arith.sitofp %276 : vector<8x128xi32> to vector<8x128xf32>
    %278 = arith.mulf %277, %270 : vector<8x128xf32>
    %c7_128 = arith.constant 7 : index
    %c0_129 = arith.constant 0 : index
    %c0_130 = arith.constant 0 : index
    %279 = vector.load %arg6[%c7_128, %c0_129, %c0_130] : memref<16x8x128xf32, #tpu.memory_space<vmem>>, vector<1x8x128xf32>
    %280 = vector.shape_cast %279 : vector<1x8x128xf32> to vector<8x128xf32>
    %281 = vector.shape_cast %278 : vector<8x128xf32> to vector<1x8x128xf32>
    tpu.vector_store %arg6[%c7_128, %c0_129, %c0_130], %281 {strides = array<i32>} : memref<16x8x128xf32, #tpu.memory_space<vmem>>, vector<1x8x128xf32>,
    %c7_131 = arith.constant 7 : index
    %c0_132 = arith.constant 0 : index
    %c0_133 = arith.constant 0 : index
    %282 = vector.load %arg7[%c7_131, %c0_132, %c0_133] : memref<16x8x128xf32, #tpu.memory_space<vmem>>, vector<1x8x128xf32>
    %283 = vector.shape_cast %282 : vector<1x8x128xf32> to vector<8x128xf32>
    %284 = vector.shape_cast %273 : vector<8x128xf32> to vector<1x8x128xf32>
    tpu.vector_store %arg7[%c7_131, %c0_132, %c0_133], %284 {strides = array<i32>} : memref<16x8x128xf32, #tpu.memory_space<vmem>>, vector<1x8x128xf32>,
    %285 = arith.truncf %278 : vector<8x128xf32> to vector<8x128xbf16>
    %c8 = arith.constant 8 : index
    %c0_134 = arith.constant 0 : index
    %c0_135 = arith.constant 0 : index
    %286 = vector.load %arg1[%c8, %c0_134, %c0_135] : memref<16x8x256xf32, #tpu.memory_space<vmem>>, vector<1x8x256xf32>
    %287 = vector.shape_cast %286 : vector<1x8x256xf32> to vector<8x256xf32>
    %cst_136 = arith.constant dense<0.000000e+00> : vector<8x256xf32>
    %288 = tpu.matmul %285, %3, %cst_136 {dimension_numbers = #tpu.dot_dimension_numbers<[1], [0], [0], [1], [0, 0, 1, 1], [], []>} : vector<8x128xbf16>, vector<128x256xbf16>, vector<8x256xf32> -> vector<8x256xf32>
    %289 = arith.addf %287, %288 : vector<8x256xf32>
    %290 = vector.extract_strided_slice %289 {offsets = [0, 0], sizes = [8, 128], strides = [1, 1]} : vector<8x256xf32> to vector<8x128xf32>
    %291 = arith.negf %290 : vector<8x128xf32>
    %292 = math.exp %291 : vector<8x128xf32>
    %cst_137 = arith.constant 1.000000e+00 : f32
    %293 = vector.broadcast %cst_137 : f32 to vector<8x128xf32>
    %294 = arith.addf %293, %292 : vector<8x128xf32>
    %295 = arith.divf %293, %294 : vector<8x128xf32>
    %296 = vector.extract_strided_slice %289 {offsets = [0, 128], sizes = [8, 128], strides = [1, 1]} : vector<8x256xf32> to vector<8x128xf32>
    %297 = arith.mulf %295, %273 : vector<8x128xf32>
    %cst_138 = arith.constant 1.000000e+00 : f32
    %298 = vector.broadcast %cst_138 : f32 to vector<8x128xf32>
    %299 = arith.subf %298, %295 : vector<8x128xf32>
    %300 = arith.mulf %299, %296 : vector<8x128xf32>
    %301 = arith.addf %297, %300 : vector<8x128xf32>
    %c8_139 = arith.constant 8 : index
    %c0_140 = arith.constant 0 : index
    %c0_141 = arith.constant 0 : index
    %302 = vector.load %arg2[%c8_139, %c0_140, %c0_141] : memref<16x1x128xf32, #tpu.memory_space<vmem>>, vector<1x1x128xf32>
    %303 = vector.shape_cast %302 : vector<1x1x128xf32> to vector<1x128xf32>
    %304 = vector.shape_cast %303 : vector<1x128xf32> to vector<1x128xf32>
    %305 = vector.broadcast %304 : vector<1x128xf32> to vector<8x128xf32>
    %cst_142 = arith.constant 0.000000e+00 : f32
    %306 = vector.broadcast %cst_142 : f32 to vector<8x128xf32>
    %307 = arith.cmpf oeq, %305, %306 : vector<8x128xf32>
    %308 = arith.select %307, %273, %301 : vector<8x128xi1>, vector<8x128xf32>
    %cst_143 = arith.constant 0.000000e+00 : f32
    %309 = vector.broadcast %cst_143 : f32 to vector<8x128xf32>
    %310 = arith.cmpf oge, %308, %309 : vector<8x128xf32>
    %311 = arith.extui %310 : vector<8x128xi1> to vector<8x128xi32>
    %312 = arith.sitofp %311 : vector<8x128xi32> to vector<8x128xf32>
    %313 = arith.mulf %312, %305 : vector<8x128xf32>
    %c8_144 = arith.constant 8 : index
    %c0_145 = arith.constant 0 : index
    %c0_146 = arith.constant 0 : index
    %314 = vector.load %arg6[%c8_144, %c0_145, %c0_146] : memref<16x8x128xf32, #tpu.memory_space<vmem>>, vector<1x8x128xf32>
    %315 = vector.shape_cast %314 : vector<1x8x128xf32> to vector<8x128xf32>
    %316 = vector.shape_cast %313 : vector<8x128xf32> to vector<1x8x128xf32>
    tpu.vector_store %arg6[%c8_144, %c0_145, %c0_146], %316 {strides = array<i32>} : memref<16x8x128xf32, #tpu.memory_space<vmem>>, vector<1x8x128xf32>,
    %c8_147 = arith.constant 8 : index
    %c0_148 = arith.constant 0 : index
    %c0_149 = arith.constant 0 : index
    %317 = vector.load %arg7[%c8_147, %c0_148, %c0_149] : memref<16x8x128xf32, #tpu.memory_space<vmem>>, vector<1x8x128xf32>
    %318 = vector.shape_cast %317 : vector<1x8x128xf32> to vector<8x128xf32>
    %319 = vector.shape_cast %308 : vector<8x128xf32> to vector<1x8x128xf32>
    tpu.vector_store %arg7[%c8_147, %c0_148, %c0_149], %319 {strides = array<i32>} : memref<16x8x128xf32, #tpu.memory_space<vmem>>, vector<1x8x128xf32>,
    %320 = arith.truncf %313 : vector<8x128xf32> to vector<8x128xbf16>
    %c9 = arith.constant 9 : index
    %c0_150 = arith.constant 0 : index
    %c0_151 = arith.constant 0 : index
    %321 = vector.load %arg1[%c9, %c0_150, %c0_151] : memref<16x8x256xf32, #tpu.memory_space<vmem>>, vector<1x8x256xf32>
    %322 = vector.shape_cast %321 : vector<1x8x256xf32> to vector<8x256xf32>
    %cst_152 = arith.constant dense<0.000000e+00> : vector<8x256xf32>
    %323 = tpu.matmul %320, %3, %cst_152 {dimension_numbers = #tpu.dot_dimension_numbers<[1], [0], [0], [1], [0, 0, 1, 1], [], []>} : vector<8x128xbf16>, vector<128x256xbf16>, vector<8x256xf32> -> vector<8x256xf32>
    %324 = arith.addf %322, %323 : vector<8x256xf32>
    %325 = vector.extract_strided_slice %324 {offsets = [0, 0], sizes = [8, 128], strides = [1, 1]} : vector<8x256xf32> to vector<8x128xf32>
    %326 = arith.negf %325 : vector<8x128xf32>
    %327 = math.exp %326 : vector<8x128xf32>
    %cst_153 = arith.constant 1.000000e+00 : f32
    %328 = vector.broadcast %cst_153 : f32 to vector<8x128xf32>
    %329 = arith.addf %328, %327 : vector<8x128xf32>
    %330 = arith.divf %328, %329 : vector<8x128xf32>
    %331 = vector.extract_strided_slice %324 {offsets = [0, 128], sizes = [8, 128], strides = [1, 1]} : vector<8x256xf32> to vector<8x128xf32>
    %332 = arith.mulf %330, %308 : vector<8x128xf32>
    %cst_154 = arith.constant 1.000000e+00 : f32
    %333 = vector.broadcast %cst_154 : f32 to vector<8x128xf32>
    %334 = arith.subf %333, %330 : vector<8x128xf32>
    %335 = arith.mulf %334, %331 : vector<8x128xf32>
    %336 = arith.addf %332, %335 : vector<8x128xf32>
    %c9_155 = arith.constant 9 : index
    %c0_156 = arith.constant 0 : index
    %c0_157 = arith.constant 0 : index
    %337 = vector.load %arg2[%c9_155, %c0_156, %c0_157] : memref<16x1x128xf32, #tpu.memory_space<vmem>>, vector<1x1x128xf32>
    %338 = vector.shape_cast %337 : vector<1x1x128xf32> to vector<1x128xf32>
    %339 = vector.shape_cast %338 : vector<1x128xf32> to vector<1x128xf32>
    %340 = vector.broadcast %339 : vector<1x128xf32> to vector<8x128xf32>
    %cst_158 = arith.constant 0.000000e+00 : f32
    %341 = vector.broadcast %cst_158 : f32 to vector<8x128xf32>
    %342 = arith.cmpf oeq, %340, %341 : vector<8x128xf32>
    %343 = arith.select %342, %308, %336 : vector<8x128xi1>, vector<8x128xf32>
    %cst_159 = arith.constant 0.000000e+00 : f32
    %344 = vector.broadcast %cst_159 : f32 to vector<8x128xf32>
    %345 = arith.cmpf oge, %343, %344 : vector<8x128xf32>
    %346 = arith.extui %345 : vector<8x128xi1> to vector<8x128xi32>
    %347 = arith.sitofp %346 : vector<8x128xi32> to vector<8x128xf32>
    %348 = arith.mulf %347, %340 : vector<8x128xf32>
    %c9_160 = arith.constant 9 : index
    %c0_161 = arith.constant 0 : index
    %c0_162 = arith.constant 0 : index
    %349 = vector.load %arg6[%c9_160, %c0_161, %c0_162] : memref<16x8x128xf32, #tpu.memory_space<vmem>>, vector<1x8x128xf32>
    %350 = vector.shape_cast %349 : vector<1x8x128xf32> to vector<8x128xf32>
    %351 = vector.shape_cast %348 : vector<8x128xf32> to vector<1x8x128xf32>
    tpu.vector_store %arg6[%c9_160, %c0_161, %c0_162], %351 {strides = array<i32>} : memref<16x8x128xf32, #tpu.memory_space<vmem>>, vector<1x8x128xf32>,
    %c9_163 = arith.constant 9 : index
    %c0_164 = arith.constant 0 : index
    %c0_165 = arith.constant 0 : index
    %352 = vector.load %arg7[%c9_163, %c0_164, %c0_165] : memref<16x8x128xf32, #tpu.memory_space<vmem>>, vector<1x8x128xf32>
    %353 = vector.shape_cast %352 : vector<1x8x128xf32> to vector<8x128xf32>
    %354 = vector.shape_cast %343 : vector<8x128xf32> to vector<1x8x128xf32>
    tpu.vector_store %arg7[%c9_163, %c0_164, %c0_165], %354 {strides = array<i32>} : memref<16x8x128xf32, #tpu.memory_space<vmem>>, vector<1x8x128xf32>,
    %355 = arith.truncf %348 : vector<8x128xf32> to vector<8x128xbf16>
    %c10 = arith.constant 10 : index
    %c0_166 = arith.constant 0 : index
    %c0_167 = arith.constant 0 : index
    %356 = vector.load %arg1[%c10, %c0_166, %c0_167] : memref<16x8x256xf32, #tpu.memory_space<vmem>>, vector<1x8x256xf32>
    %357 = vector.shape_cast %356 : vector<1x8x256xf32> to vector<8x256xf32>
    %cst_168 = arith.constant dense<0.000000e+00> : vector<8x256xf32>
    %358 = tpu.matmul %355, %3, %cst_168 {dimension_numbers = #tpu.dot_dimension_numbers<[1], [0], [0], [1], [0, 0, 1, 1], [], []>} : vector<8x128xbf16>, vector<128x256xbf16>, vector<8x256xf32> -> vector<8x256xf32>
    %359 = arith.addf %357, %358 : vector<8x256xf32>
    %360 = vector.extract_strided_slice %359 {offsets = [0, 0], sizes = [8, 128], strides = [1, 1]} : vector<8x256xf32> to vector<8x128xf32>
    %361 = arith.negf %360 : vector<8x128xf32>
    %362 = math.exp %361 : vector<8x128xf32>
    %cst_169 = arith.constant 1.000000e+00 : f32
    %363 = vector.broadcast %cst_169 : f32 to vector<8x128xf32>
    %364 = arith.addf %363, %362 : vector<8x128xf32>
    %365 = arith.divf %363, %364 : vector<8x128xf32>
    %366 = vector.extract_strided_slice %359 {offsets = [0, 128], sizes = [8, 128], strides = [1, 1]} : vector<8x256xf32> to vector<8x128xf32>
    %367 = arith.mulf %365, %343 : vector<8x128xf32>
    %cst_170 = arith.constant 1.000000e+00 : f32
    %368 = vector.broadcast %cst_170 : f32 to vector<8x128xf32>
    %369 = arith.subf %368, %365 : vector<8x128xf32>
    %370 = arith.mulf %369, %366 : vector<8x128xf32>
    %371 = arith.addf %367, %370 : vector<8x128xf32>
    %c10_171 = arith.constant 10 : index
    %c0_172 = arith.constant 0 : index
    %c0_173 = arith.constant 0 : index
    %372 = vector.load %arg2[%c10_171, %c0_172, %c0_173] : memref<16x1x128xf32, #tpu.memory_space<vmem>>, vector<1x1x128xf32>
    %373 = vector.shape_cast %372 : vector<1x1x128xf32> to vector<1x128xf32>
    %374 = vector.shape_cast %373 : vector<1x128xf32> to vector<1x128xf32>
    %375 = vector.broadcast %374 : vector<1x128xf32> to vector<8x128xf32>
    %cst_174 = arith.constant 0.000000e+00 : f32
    %376 = vector.broadcast %cst_174 : f32 to vector<8x128xf32>
    %377 = arith.cmpf oeq, %375, %376 : vector<8x128xf32>
    %378 = arith.select %377, %343, %371 : vector<8x128xi1>, vector<8x128xf32>
    %cst_175 = arith.constant 0.000000e+00 : f32
    %379 = vector.broadcast %cst_175 : f32 to vector<8x128xf32>
    %380 = arith.cmpf oge, %378, %379 : vector<8x128xf32>
    %381 = arith.extui %380 : vector<8x128xi1> to vector<8x128xi32>
    %382 = arith.sitofp %381 : vector<8x128xi32> to vector<8x128xf32>
    %383 = arith.mulf %382, %375 : vector<8x128xf32>
    %c10_176 = arith.constant 10 : index
    %c0_177 = arith.constant 0 : index
    %c0_178 = arith.constant 0 : index
    %384 = vector.load %arg6[%c10_176, %c0_177, %c0_178] : memref<16x8x128xf32, #tpu.memory_space<vmem>>, vector<1x8x128xf32>
    %385 = vector.shape_cast %384 : vector<1x8x128xf32> to vector<8x128xf32>
    %386 = vector.shape_cast %383 : vector<8x128xf32> to vector<1x8x128xf32>
    tpu.vector_store %arg6[%c10_176, %c0_177, %c0_178], %386 {strides = array<i32>} : memref<16x8x128xf32, #tpu.memory_space<vmem>>, vector<1x8x128xf32>,
    %c10_179 = arith.constant 10 : index
    %c0_180 = arith.constant 0 : index
    %c0_181 = arith.constant 0 : index
    %387 = vector.load %arg7[%c10_179, %c0_180, %c0_181] : memref<16x8x128xf32, #tpu.memory_space<vmem>>, vector<1x8x128xf32>
    %388 = vector.shape_cast %387 : vector<1x8x128xf32> to vector<8x128xf32>
    %389 = vector.shape_cast %378 : vector<8x128xf32> to vector<1x8x128xf32>
    tpu.vector_store %arg7[%c10_179, %c0_180, %c0_181], %389 {strides = array<i32>} : memref<16x8x128xf32, #tpu.memory_space<vmem>>, vector<1x8x128xf32>,
    %390 = arith.truncf %383 : vector<8x128xf32> to vector<8x128xbf16>
    %c11 = arith.constant 11 : index
    %c0_182 = arith.constant 0 : index
    %c0_183 = arith.constant 0 : index
    %391 = vector.load %arg1[%c11, %c0_182, %c0_183] : memref<16x8x256xf32, #tpu.memory_space<vmem>>, vector<1x8x256xf32>
    %392 = vector.shape_cast %391 : vector<1x8x256xf32> to vector<8x256xf32>
    %cst_184 = arith.constant dense<0.000000e+00> : vector<8x256xf32>
    %393 = tpu.matmul %390, %3, %cst_184 {dimension_numbers = #tpu.dot_dimension_numbers<[1], [0], [0], [1], [0, 0, 1, 1], [], []>} : vector<8x128xbf16>, vector<128x256xbf16>, vector<8x256xf32> -> vector<8x256xf32>
    %394 = arith.addf %392, %393 : vector<8x256xf32>
    %395 = vector.extract_strided_slice %394 {offsets = [0, 0], sizes = [8, 128], strides = [1, 1]} : vector<8x256xf32> to vector<8x128xf32>
    %396 = arith.negf %395 : vector<8x128xf32>
    %397 = math.exp %396 : vector<8x128xf32>
    %cst_185 = arith.constant 1.000000e+00 : f32
    %398 = vector.broadcast %cst_185 : f32 to vector<8x128xf32>
    %399 = arith.addf %398, %397 : vector<8x128xf32>
    %400 = arith.divf %398, %399 : vector<8x128xf32>
    %401 = vector.extract_strided_slice %394 {offsets = [0, 128], sizes = [8, 128], strides = [1, 1]} : vector<8x256xf32> to vector<8x128xf32>
    %402 = arith.mulf %400, %378 : vector<8x128xf32>
    %cst_186 = arith.constant 1.000000e+00 : f32
    %403 = vector.broadcast %cst_186 : f32 to vector<8x128xf32>
    %404 = arith.subf %403, %400 : vector<8x128xf32>
    %405 = arith.mulf %404, %401 : vector<8x128xf32>
    %406 = arith.addf %402, %405 : vector<8x128xf32>
    %c11_187 = arith.constant 11 : index
    %c0_188 = arith.constant 0 : index
    %c0_189 = arith.constant 0 : index
    %407 = vector.load %arg2[%c11_187, %c0_188, %c0_189] : memref<16x1x128xf32, #tpu.memory_space<vmem>>, vector<1x1x128xf32>
    %408 = vector.shape_cast %407 : vector<1x1x128xf32> to vector<1x128xf32>
    %409 = vector.shape_cast %408 : vector<1x128xf32> to vector<1x128xf32>
    %410 = vector.broadcast %409 : vector<1x128xf32> to vector<8x128xf32>
    %cst_190 = arith.constant 0.000000e+00 : f32
    %411 = vector.broadcast %cst_190 : f32 to vector<8x128xf32>
    %412 = arith.cmpf oeq, %410, %411 : vector<8x128xf32>
    %413 = arith.select %412, %378, %406 : vector<8x128xi1>, vector<8x128xf32>
    %cst_191 = arith.constant 0.000000e+00 : f32
    %414 = vector.broadcast %cst_191 : f32 to vector<8x128xf32>
    %415 = arith.cmpf oge, %413, %414 : vector<8x128xf32>
    %416 = arith.extui %415 : vector<8x128xi1> to vector<8x128xi32>
    %417 = arith.sitofp %416 : vector<8x128xi32> to vector<8x128xf32>
    %418 = arith.mulf %417, %410 : vector<8x128xf32>
    %c11_192 = arith.constant 11 : index
    %c0_193 = arith.constant 0 : index
    %c0_194 = arith.constant 0 : index
    %419 = vector.load %arg6[%c11_192, %c0_193, %c0_194] : memref<16x8x128xf32, #tpu.memory_space<vmem>>, vector<1x8x128xf32>
    %420 = vector.shape_cast %419 : vector<1x8x128xf32> to vector<8x128xf32>
    %421 = vector.shape_cast %418 : vector<8x128xf32> to vector<1x8x128xf32>
    tpu.vector_store %arg6[%c11_192, %c0_193, %c0_194], %421 {strides = array<i32>} : memref<16x8x128xf32, #tpu.memory_space<vmem>>, vector<1x8x128xf32>,
    %c11_195 = arith.constant 11 : index
    %c0_196 = arith.constant 0 : index
    %c0_197 = arith.constant 0 : index
    %422 = vector.load %arg7[%c11_195, %c0_196, %c0_197] : memref<16x8x128xf32, #tpu.memory_space<vmem>>, vector<1x8x128xf32>
    %423 = vector.shape_cast %422 : vector<1x8x128xf32> to vector<8x128xf32>
    %424 = vector.shape_cast %413 : vector<8x128xf32> to vector<1x8x128xf32>
    tpu.vector_store %arg7[%c11_195, %c0_196, %c0_197], %424 {strides = array<i32>} : memref<16x8x128xf32, #tpu.memory_space<vmem>>, vector<1x8x128xf32>,
    %425 = arith.truncf %418 : vector<8x128xf32> to vector<8x128xbf16>
    %c12 = arith.constant 12 : index
    %c0_198 = arith.constant 0 : index
    %c0_199 = arith.constant 0 : index
    %426 = vector.load %arg1[%c12, %c0_198, %c0_199] : memref<16x8x256xf32, #tpu.memory_space<vmem>>, vector<1x8x256xf32>
    %427 = vector.shape_cast %426 : vector<1x8x256xf32> to vector<8x256xf32>
    %cst_200 = arith.constant dense<0.000000e+00> : vector<8x256xf32>
    %428 = tpu.matmul %425, %3, %cst_200 {dimension_numbers = #tpu.dot_dimension_numbers<[1], [0], [0], [1], [0, 0, 1, 1], [], []>} : vector<8x128xbf16>, vector<128x256xbf16>, vector<8x256xf32> -> vector<8x256xf32>
    %429 = arith.addf %427, %428 : vector<8x256xf32>
    %430 = vector.extract_strided_slice %429 {offsets = [0, 0], sizes = [8, 128], strides = [1, 1]} : vector<8x256xf32> to vector<8x128xf32>
    %431 = arith.negf %430 : vector<8x128xf32>
    %432 = math.exp %431 : vector<8x128xf32>
    %cst_201 = arith.constant 1.000000e+00 : f32
    %433 = vector.broadcast %cst_201 : f32 to vector<8x128xf32>
    %434 = arith.addf %433, %432 : vector<8x128xf32>
    %435 = arith.divf %433, %434 : vector<8x128xf32>
    %436 = vector.extract_strided_slice %429 {offsets = [0, 128], sizes = [8, 128], strides = [1, 1]} : vector<8x256xf32> to vector<8x128xf32>
    %437 = arith.mulf %435, %413 : vector<8x128xf32>
    %cst_202 = arith.constant 1.000000e+00 : f32
    %438 = vector.broadcast %cst_202 : f32 to vector<8x128xf32>
    %439 = arith.subf %438, %435 : vector<8x128xf32>
    %440 = arith.mulf %439, %436 : vector<8x128xf32>
    %441 = arith.addf %437, %440 : vector<8x128xf32>
    %c12_203 = arith.constant 12 : index
    %c0_204 = arith.constant 0 : index
    %c0_205 = arith.constant 0 : index
    %442 = vector.load %arg2[%c12_203, %c0_204, %c0_205] : memref<16x1x128xf32, #tpu.memory_space<vmem>>, vector<1x1x128xf32>
    %443 = vector.shape_cast %442 : vector<1x1x128xf32> to vector<1x128xf32>
    %444 = vector.shape_cast %443 : vector<1x128xf32> to vector<1x128xf32>
    %445 = vector.broadcast %444 : vector<1x128xf32> to vector<8x128xf32>
    %cst_206 = arith.constant 0.000000e+00 : f32
    %446 = vector.broadcast %cst_206 : f32 to vector<8x128xf32>
    %447 = arith.cmpf oeq, %445, %446 : vector<8x128xf32>
    %448 = arith.select %447, %413, %441 : vector<8x128xi1>, vector<8x128xf32>
    %cst_207 = arith.constant 0.000000e+00 : f32
    %449 = vector.broadcast %cst_207 : f32 to vector<8x128xf32>
    %450 = arith.cmpf oge, %448, %449 : vector<8x128xf32>
    %451 = arith.extui %450 : vector<8x128xi1> to vector<8x128xi32>
    %452 = arith.sitofp %451 : vector<8x128xi32> to vector<8x128xf32>
    %453 = arith.mulf %452, %445 : vector<8x128xf32>
    %c12_208 = arith.constant 12 : index
    %c0_209 = arith.constant 0 : index
    %c0_210 = arith.constant 0 : index
    %454 = vector.load %arg6[%c12_208, %c0_209, %c0_210] : memref<16x8x128xf32, #tpu.memory_space<vmem>>, vector<1x8x128xf32>
    %455 = vector.shape_cast %454 : vector<1x8x128xf32> to vector<8x128xf32>
    %456 = vector.shape_cast %453 : vector<8x128xf32> to vector<1x8x128xf32>
    tpu.vector_store %arg6[%c12_208, %c0_209, %c0_210], %456 {strides = array<i32>} : memref<16x8x128xf32, #tpu.memory_space<vmem>>, vector<1x8x128xf32>,
    %c12_211 = arith.constant 12 : index
    %c0_212 = arith.constant 0 : index
    %c0_213 = arith.constant 0 : index
    %457 = vector.load %arg7[%c12_211, %c0_212, %c0_213] : memref<16x8x128xf32, #tpu.memory_space<vmem>>, vector<1x8x128xf32>
    %458 = vector.shape_cast %457 : vector<1x8x128xf32> to vector<8x128xf32>
    %459 = vector.shape_cast %448 : vector<8x128xf32> to vector<1x8x128xf32>
    tpu.vector_store %arg7[%c12_211, %c0_212, %c0_213], %459 {strides = array<i32>} : memref<16x8x128xf32, #tpu.memory_space<vmem>>, vector<1x8x128xf32>,
    %460 = arith.truncf %453 : vector<8x128xf32> to vector<8x128xbf16>
    %c13 = arith.constant 13 : index
    %c0_214 = arith.constant 0 : index
    %c0_215 = arith.constant 0 : index
    %461 = vector.load %arg1[%c13, %c0_214, %c0_215] : memref<16x8x256xf32, #tpu.memory_space<vmem>>, vector<1x8x256xf32>
    %462 = vector.shape_cast %461 : vector<1x8x256xf32> to vector<8x256xf32>
    %cst_216 = arith.constant dense<0.000000e+00> : vector<8x256xf32>
    %463 = tpu.matmul %460, %3, %cst_216 {dimension_numbers = #tpu.dot_dimension_numbers<[1], [0], [0], [1], [0, 0, 1, 1], [], []>} : vector<8x128xbf16>, vector<128x256xbf16>, vector<8x256xf32> -> vector<8x256xf32>
    %464 = arith.addf %462, %463 : vector<8x256xf32>
    %465 = vector.extract_strided_slice %464 {offsets = [0, 0], sizes = [8, 128], strides = [1, 1]} : vector<8x256xf32> to vector<8x128xf32>
    %466 = arith.negf %465 : vector<8x128xf32>
    %467 = math.exp %466 : vector<8x128xf32>
    %cst_217 = arith.constant 1.000000e+00 : f32
    %468 = vector.broadcast %cst_217 : f32 to vector<8x128xf32>
    %469 = arith.addf %468, %467 : vector<8x128xf32>
    %470 = arith.divf %468, %469 : vector<8x128xf32>
    %471 = vector.extract_strided_slice %464 {offsets = [0, 128], sizes = [8, 128], strides = [1, 1]} : vector<8x256xf32> to vector<8x128xf32>
    %472 = arith.mulf %470, %448 : vector<8x128xf32>
    %cst_218 = arith.constant 1.000000e+00 : f32
    %473 = vector.broadcast %cst_218 : f32 to vector<8x128xf32>
    %474 = arith.subf %473, %470 : vector<8x128xf32>
    %475 = arith.mulf %474, %471 : vector<8x128xf32>
    %476 = arith.addf %472, %475 : vector<8x128xf32>
    %c13_219 = arith.constant 13 : index
    %c0_220 = arith.constant 0 : index
    %c0_221 = arith.constant 0 : index
    %477 = vector.load %arg2[%c13_219, %c0_220, %c0_221] : memref<16x1x128xf32, #tpu.memory_space<vmem>>, vector<1x1x128xf32>
    %478 = vector.shape_cast %477 : vector<1x1x128xf32> to vector<1x128xf32>
    %479 = vector.shape_cast %478 : vector<1x128xf32> to vector<1x128xf32>
    %480 = vector.broadcast %479 : vector<1x128xf32> to vector<8x128xf32>
    %cst_222 = arith.constant 0.000000e+00 : f32
    %481 = vector.broadcast %cst_222 : f32 to vector<8x128xf32>
    %482 = arith.cmpf oeq, %480, %481 : vector<8x128xf32>
    %483 = arith.select %482, %448, %476 : vector<8x128xi1>, vector<8x128xf32>
    %cst_223 = arith.constant 0.000000e+00 : f32
    %484 = vector.broadcast %cst_223 : f32 to vector<8x128xf32>
    %485 = arith.cmpf oge, %483, %484 : vector<8x128xf32>
    %486 = arith.extui %485 : vector<8x128xi1> to vector<8x128xi32>
    %487 = arith.sitofp %486 : vector<8x128xi32> to vector<8x128xf32>
    %488 = arith.mulf %487, %480 : vector<8x128xf32>
    %c13_224 = arith.constant 13 : index
    %c0_225 = arith.constant 0 : index
    %c0_226 = arith.constant 0 : index
    %489 = vector.load %arg6[%c13_224, %c0_225, %c0_226] : memref<16x8x128xf32, #tpu.memory_space<vmem>>, vector<1x8x128xf32>
    %490 = vector.shape_cast %489 : vector<1x8x128xf32> to vector<8x128xf32>
    %491 = vector.shape_cast %488 : vector<8x128xf32> to vector<1x8x128xf32>
    tpu.vector_store %arg6[%c13_224, %c0_225, %c0_226], %491 {strides = array<i32>} : memref<16x8x128xf32, #tpu.memory_space<vmem>>, vector<1x8x128xf32>,
    %c13_227 = arith.constant 13 : index
    %c0_228 = arith.constant 0 : index
    %c0_229 = arith.constant 0 : index
    %492 = vector.load %arg7[%c13_227, %c0_228, %c0_229] : memref<16x8x128xf32, #tpu.memory_space<vmem>>, vector<1x8x128xf32>
    %493 = vector.shape_cast %492 : vector<1x8x128xf32> to vector<8x128xf32>
    %494 = vector.shape_cast %483 : vector<8x128xf32> to vector<1x8x128xf32>
    tpu.vector_store %arg7[%c13_227, %c0_228, %c0_229], %494 {strides = array<i32>} : memref<16x8x128xf32, #tpu.memory_space<vmem>>, vector<1x8x128xf32>,
    %495 = arith.truncf %488 : vector<8x128xf32> to vector<8x128xbf16>
    %c14 = arith.constant 14 : index
    %c0_230 = arith.constant 0 : index
    %c0_231 = arith.constant 0 : index
    %496 = vector.load %arg1[%c14, %c0_230, %c0_231] : memref<16x8x256xf32, #tpu.memory_space<vmem>>, vector<1x8x256xf32>
    %497 = vector.shape_cast %496 : vector<1x8x256xf32> to vector<8x256xf32>
    %cst_232 = arith.constant dense<0.000000e+00> : vector<8x256xf32>
    %498 = tpu.matmul %495, %3, %cst_232 {dimension_numbers = #tpu.dot_dimension_numbers<[1], [0], [0], [1], [0, 0, 1, 1], [], []>} : vector<8x128xbf16>, vector<128x256xbf16>, vector<8x256xf32> -> vector<8x256xf32>
    %499 = arith.addf %497, %498 : vector<8x256xf32>
    %500 = vector.extract_strided_slice %499 {offsets = [0, 0], sizes = [8, 128], strides = [1, 1]} : vector<8x256xf32> to vector<8x128xf32>
    %501 = arith.negf %500 : vector<8x128xf32>
    %502 = math.exp %501 : vector<8x128xf32>
    %cst_233 = arith.constant 1.000000e+00 : f32
    %503 = vector.broadcast %cst_233 : f32 to vector<8x128xf32>
    %504 = arith.addf %503, %502 : vector<8x128xf32>
    %505 = arith.divf %503, %504 : vector<8x128xf32>
    %506 = vector.extract_strided_slice %499 {offsets = [0, 128], sizes = [8, 128], strides = [1, 1]} : vector<8x256xf32> to vector<8x128xf32>
    %507 = arith.mulf %505, %483 : vector<8x128xf32>
    %cst_234 = arith.constant 1.000000e+00 : f32
    %508 = vector.broadcast %cst_234 : f32 to vector<8x128xf32>
    %509 = arith.subf %508, %505 : vector<8x128xf32>
    %510 = arith.mulf %509, %506 : vector<8x128xf32>
    %511 = arith.addf %507, %510 : vector<8x128xf32>
    %c14_235 = arith.constant 14 : index
    %c0_236 = arith.constant 0 : index
    %c0_237 = arith.constant 0 : index
    %512 = vector.load %arg2[%c14_235, %c0_236, %c0_237] : memref<16x1x128xf32, #tpu.memory_space<vmem>>, vector<1x1x128xf32>
    %513 = vector.shape_cast %512 : vector<1x1x128xf32> to vector<1x128xf32>
    %514 = vector.shape_cast %513 : vector<1x128xf32> to vector<1x128xf32>
    %515 = vector.broadcast %514 : vector<1x128xf32> to vector<8x128xf32>
    %cst_238 = arith.constant 0.000000e+00 : f32
    %516 = vector.broadcast %cst_238 : f32 to vector<8x128xf32>
    %517 = arith.cmpf oeq, %515, %516 : vector<8x128xf32>
    %518 = arith.select %517, %483, %511 : vector<8x128xi1>, vector<8x128xf32>
    %cst_239 = arith.constant 0.000000e+00 : f32
    %519 = vector.broadcast %cst_239 : f32 to vector<8x128xf32>
    %520 = arith.cmpf oge, %518, %519 : vector<8x128xf32>
    %521 = arith.extui %520 : vector<8x128xi1> to vector<8x128xi32>
    %522 = arith.sitofp %521 : vector<8x128xi32> to vector<8x128xf32>
    %523 = arith.mulf %522, %515 : vector<8x128xf32>
    %c14_240 = arith.constant 14 : index
    %c0_241 = arith.constant 0 : index
    %c0_242 = arith.constant 0 : index
    %524 = vector.load %arg6[%c14_240, %c0_241, %c0_242] : memref<16x8x128xf32, #tpu.memory_space<vmem>>, vector<1x8x128xf32>
    %525 = vector.shape_cast %524 : vector<1x8x128xf32> to vector<8x128xf32>
    %526 = vector.shape_cast %523 : vector<8x128xf32> to vector<1x8x128xf32>
    tpu.vector_store %arg6[%c14_240, %c0_241, %c0_242], %526 {strides = array<i32>} : memref<16x8x128xf32, #tpu.memory_space<vmem>>, vector<1x8x128xf32>,
    %c14_243 = arith.constant 14 : index
    %c0_244 = arith.constant 0 : index
    %c0_245 = arith.constant 0 : index
    %527 = vector.load %arg7[%c14_243, %c0_244, %c0_245] : memref<16x8x128xf32, #tpu.memory_space<vmem>>, vector<1x8x128xf32>
    %528 = vector.shape_cast %527 : vector<1x8x128xf32> to vector<8x128xf32>
    %529 = vector.shape_cast %518 : vector<8x128xf32> to vector<1x8x128xf32>
    tpu.vector_store %arg7[%c14_243, %c0_244, %c0_245], %529 {strides = array<i32>} : memref<16x8x128xf32, #tpu.memory_space<vmem>>, vector<1x8x128xf32>,
    %530 = arith.truncf %523 : vector<8x128xf32> to vector<8x128xbf16>
    %c15 = arith.constant 15 : index
    %c0_246 = arith.constant 0 : index
    %c0_247 = arith.constant 0 : index
    %531 = vector.load %arg1[%c15, %c0_246, %c0_247] : memref<16x8x256xf32, #tpu.memory_space<vmem>>, vector<1x8x256xf32>
    %532 = vector.shape_cast %531 : vector<1x8x256xf32> to vector<8x256xf32>
    %cst_248 = arith.constant dense<0.000000e+00> : vector<8x256xf32>
    %533 = tpu.matmul %530, %3, %cst_248 {dimension_numbers = #tpu.dot_dimension_numbers<[1], [0], [0], [1], [0, 0, 1, 1], [], []>} : vector<8x128xbf16>, vector<128x256xbf16>, vector<8x256xf32> -> vector<8x256xf32>
    %534 = arith.addf %532, %533 : vector<8x256xf32>
    %535 = vector.extract_strided_slice %534 {offsets = [0, 0], sizes = [8, 128], strides = [1, 1]} : vector<8x256xf32> to vector<8x128xf32>
    %536 = arith.negf %535 : vector<8x128xf32>
    %537 = math.exp %536 : vector<8x128xf32>
    %cst_249 = arith.constant 1.000000e+00 : f32
    %538 = vector.broadcast %cst_249 : f32 to vector<8x128xf32>
    %539 = arith.addf %538, %537 : vector<8x128xf32>
    %540 = arith.divf %538, %539 : vector<8x128xf32>
    %541 = vector.extract_strided_slice %534 {offsets = [0, 128], sizes = [8, 128], strides = [1, 1]} : vector<8x256xf32> to vector<8x128xf32>
    %542 = arith.mulf %540, %518 : vector<8x128xf32>
    %cst_250 = arith.constant 1.000000e+00 : f32
    %543 = vector.broadcast %cst_250 : f32 to vector<8x128xf32>
    %544 = arith.subf %543, %540 : vector<8x128xf32>
    %545 = arith.mulf %544, %541 : vector<8x128xf32>
    %546 = arith.addf %542, %545 : vector<8x128xf32>
    %c15_251 = arith.constant 15 : index
    %c0_252 = arith.constant 0 : index
    %c0_253 = arith.constant 0 : index
    %547 = vector.load %arg2[%c15_251, %c0_252, %c0_253] : memref<16x1x128xf32, #tpu.memory_space<vmem>>, vector<1x1x128xf32>
    %548 = vector.shape_cast %547 : vector<1x1x128xf32> to vector<1x128xf32>
    %549 = vector.shape_cast %548 : vector<1x128xf32> to vector<1x128xf32>
    %550 = vector.broadcast %549 : vector<1x128xf32> to vector<8x128xf32>
    %cst_254 = arith.constant 0.000000e+00 : f32
    %551 = vector.broadcast %cst_254 : f32 to vector<8x128xf32>
    %552 = arith.cmpf oeq, %550, %551 : vector<8x128xf32>
    %553 = arith.select %552, %518, %546 : vector<8x128xi1>, vector<8x128xf32>
    %cst_255 = arith.constant 0.000000e+00 : f32
    %554 = vector.broadcast %cst_255 : f32 to vector<8x128xf32>
    %555 = arith.cmpf oge, %553, %554 : vector<8x128xf32>
    %556 = arith.extui %555 : vector<8x128xi1> to vector<8x128xi32>
    %557 = arith.sitofp %556 : vector<8x128xi32> to vector<8x128xf32>
    %558 = arith.mulf %557, %550 : vector<8x128xf32>
    %c15_256 = arith.constant 15 : index
    %c0_257 = arith.constant 0 : index
    %c0_258 = arith.constant 0 : index
    %559 = vector.load %arg6[%c15_256, %c0_257, %c0_258] : memref<16x8x128xf32, #tpu.memory_space<vmem>>, vector<1x8x128xf32>
    %560 = vector.shape_cast %559 : vector<1x8x128xf32> to vector<8x128xf32>
    %561 = vector.shape_cast %558 : vector<8x128xf32> to vector<1x8x128xf32>
    tpu.vector_store %arg6[%c15_256, %c0_257, %c0_258], %561 {strides = array<i32>} : memref<16x8x128xf32, #tpu.memory_space<vmem>>, vector<1x8x128xf32>,
    %c15_259 = arith.constant 15 : index
    %c0_260 = arith.constant 0 : index
    %c0_261 = arith.constant 0 : index
    %562 = vector.load %arg7[%c15_259, %c0_260, %c0_261] : memref<16x8x128xf32, #tpu.memory_space<vmem>>, vector<1x8x128xf32>
    %563 = vector.shape_cast %562 : vector<1x8x128xf32> to vector<8x128xf32>
    %564 = vector.shape_cast %553 : vector<8x128xf32> to vector<1x8x128xf32>
    tpu.vector_store %arg7[%c15_259, %c0_260, %c0_261], %564 {strides = array<i32>} : memref<16x8x128xf32, #tpu.memory_space<vmem>>, vector<1x8x128xf32>,
    %565 = arith.truncf %558 : vector<8x128xf32> to vector<8x128xbf16>
    %c0_262 = arith.constant 0 : index
    %c0_263 = arith.constant 0 : index
    %566 = vector.load %arg8[%c0_262, %c0_263] : memref<8x128xbf16, #tpu.memory_space<vmem>>, vector<8x128xbf16>
    tpu.vector_store %arg8[%c0_262, %c0_263], %565 {strides = array<i32>} : memref<8x128xbf16, #tpu.memory_space<vmem>>, vector<8x128xbf16>,
    %c0_264 = arith.constant 0 : index
    %c0_265 = arith.constant 0 : index
    %567 = vector.load %arg9[%c0_264, %c0_265] : memref<8x128xf32, #tpu.memory_space<vmem>>, vector<8x128xf32>
    tpu.vector_store %arg9[%c0_264, %c0_265], %553 {strides = array<i32>} : memref<8x128xf32, #tpu.memory_space<vmem>>, vector<8x128xf32>,
    return
  }
  func.func @transform_0(%arg0: i32) -> (i32, i32, i32) {
    %c0_i32 = arith.constant 0 : i32
    %c0_i32_0 = arith.constant 0 : i32
    %c0_i32_1 = arith.constant 0 : i32
    return %arg0, %c0_i32, %c0_i32_0 : i32, i32, i32
  }
  func.func @transform_1(%arg0: i32) -> (i32, i32, i32) {
    %c0_i32 = arith.constant 0 : i32
    %c0_i32_0 = arith.constant 0 : i32
    %c0_i32_1 = arith.constant 0 : i32
    return %arg0, %c0_i32, %c0_i32_0 : i32, i32, i32
  }
  func.func @transform_2(%arg0: i32) -> (i32, i32) {
    %c0_i32 = arith.constant 0 : i32
    %c0_i32_0 = arith.constant 0 : i32
    %c0_i32_1 = arith.constant 0 : i32
    return %c0_i32, %c0_i32_0 : i32, i32
  }
  func.func @transform_3(%arg0: i32) -> (i32, i32) {
    %c0_i32 = arith.constant 0 : i32
    %c0_i32_0 = arith.constant 0 : i32
    %c0_i32_1 = arith.constant 0 : i32
    return %c0_i32, %c0_i32_0 : i32, i32
  }
  func.func @transform_4(%arg0: i32) -> (i32, i32) {
    %c0_i32 = arith.constant 0 : i32
    %c0_i32_0 = arith.constant 0 : i32
    %c0_i32_1 = arith.constant 0 : i32
    return %c0_i32, %c0_i32_0 : i32, i32
  }
  func.func @transform_5(%arg0: i32) -> (i32, i32, i32) {
    %c0_i32 = arith.constant 0 : i32
    %c0_i32_0 = arith.constant 0 : i32
    %c0_i32_1 = arith.constant 0 : i32
    return %arg0, %c0_i32, %c0_i32_0 : i32, i32, i32
  }
  func.func @transform_6(%arg0: i32) -> (i32, i32, i32) {
    %c0_i32 = arith.constant 0 : i32
    %c0_i32_0 = arith.constant 0 : i32
    %c0_i32_1 = arith.constant 0 : i32
    return %arg0, %c0_i32, %c0_i32_0 : i32, i32, i32
  }
}

</mosaic_0001>

<bundles_post_ra>
// kernel: _rhy_gsu_sequence.1
= control target key start
LH: loop header
LB: loop body
LE: loop exit
PB: predicated region body
PF: predicated region fallthrough
CT: control target
= control target key end

     0   :  { %12 = vsyncpa [#allocation5], 0  ;;  %s3022_s0 = inlined_call_operand.vmem [shape: f32[32,8,256], index: 0, kind: input, shape index: {}]   ;;  %s3023_s1 = inlined_call_operand.vmem [shape: f32[32,1,128], index: 1, kind: input, shape index: {}]   ;;  %s3024_s2 = inlined_call_operand.hbm [shape: f32[8,128], index: 2, kind: input, shape index: {}]   ;;  %s3025_s3 = inlined_call_operand.hbm [shape: f32[8,128], index: 3, kind: input, shape index: {}]   ;;  %s3026_s4 = inlined_call_operand.hbm [shape: bf16[128,256], index: 4, kind: input, shape index: {}]   ;;  %s3027_s5 = inlined_call_operand.hbm [shape: f32[32,8,128], index: 5, kind: output, shape index: {0}]   ;;  %s3028_s6 = inlined_call_operand.hbm [shape: f32[32,8,128], index: 6, kind: output, shape index: {1}]  }
   0x1   :  { %13 = vsyncpa [#allocation8], 0 }
   0x2   :  { %14 = vsyncpa [#allocation6], 0 }
   0x3   :  { %16 = vsyncpa [#allocation6 + $0x1], 0 }
   0x4   :  { %17 = vsyncpa [#allocation12], 0 }
   0x5   :  { %19 = vsyncpa [#allocation12 + $0x1], 0  ;;  %s2378_s21 = smov 0   ;;  %s2380_s22 = smov 0  }
   0x6   :  { %s2382_s23 = smov 0   ;;  %s2384_s24 = smov 0  }
   0x7 LB: > { %s2399_s25 = sadd.s32 4294967295, %s2330_s24   ;;  %s1802_s26 = sadd.s32 4294967294, %s2330_s24   ;;  %s2330_s24 = sphi %s2384_s24, %s3048_s24   ;;  %s2326_s23 = sphi %s2382_s23, %s3047_s23   ;;  %s2322_s22 = sphi %s2380_s22, %s3046_s22   ;;  %s2318_s21 = sphi %s2378_s21, %s3045_s21  }
   0x8   : > { %s2403_s27 = sadd.s32 1, %s2330_s24   ;;  %s147_s28 = sadd.s32 1, %s2326_s23 }
   0x9   : > { %s144_s29 = ssub.s32 %s2330_s24, %s2403_s27  ;;  %p157_p0 = scmp.ne.s32.totalorder %s2326_s23, %s2322_s22 }
   0xa   : > { %p145_p1 = scmp.eq.s32.totalorder %s144_s29, 0  ;;  %p158_p2 = scmp.eq.s32.totalorder %s2399_s25, 1 }
   0xb   : > { %p163_p3 = scmp.ne.s32.totalorder %s2322_s22, %s2318_s21  ;;  %p164_p4 = scmp.eq.s32.totalorder %s1802_s26, 1 }
   0xc   : > { %s2414_s30 = scalar_select %p145_p1, %s2326_s23, %s147_s28  }
   0xd   : > { %p2416_p5 = por %p158_p2, %p157_p0  ;;  %p2420_p6 = por %p164_p4, %p163_p3 }
   0xe   : > { %p1803_p7 = scmp.ge.s32.totalorder %s2330_s24, 1  ;;  %p197_p8 = scmp.lt.s32.totalorder %s2330_s24, 3 }
   0xf   : > { %s3032_s7 = scalar_select %p2416_p5, 1, 0 }
  0x10   : > { %s3033_s8 = scalar_select %p2420_p6, 1, 0 }
  0x11   : > { %p3029_p10 = scmp.eq.s32.totalorder %s2399_s25, 0  ;;  %p2428_p11 = pnand %p1803_p7, %p197_p8 }
  0x12   : > { %s2332_s10 = smov [#allocation7]   ;;  %s2333_s12 = smov [#allocation4]  }
  0x13   : > { %s3034_s9 = scalar_select %p2428_p11, 1, 0 }
  0x14   : > { %s221_s11 = sshll.u32 %s2332_s10, 4  ;;  %p1985_p12 = pneg %p2428_p11  ;;  %s222_s11 = int_to_ptr.vmem [resolvable:$true] %s221_s11 }
  0x15   : > { %s210_s13 = sshll.u32 %s2333_s12, 4  ;;  %s2334_s15 = smov [#allocation9]   ;;  %s211_s13 = int_to_ptr.vmem [resolvable:$true] %s210_s13 }
  0x16   : > { %p2436_p13 = pnand %p3029_p10, %p1985_p12  ;;  %s231_s16 = sshll.u32 %s2334_s15, 4  ;;  %s2440_s16 = int_to_ptr.vmem [resolvable:$true] %s231_s16 }
  0x17   : > { %s2165_s17 = scalar_lea.vmem %s222_s11, 128  ;;  %p2173_p4 = scmp.lt.s32.totalorder %s222_s11, %s222_s11 }
  0x18   : > { %p2156_p0 = pneg %p2436_p13  ;;  %p2166_p1 = scmp.ne.s32.totalorder %s222_s11, %s2165_s17 }
  0x19   : > { %p2174_p7 = scmp.lt.s32.totalorder %s2165_s17, %s2165_s17 }
  0x1a   : > { %p2168_p2 = pnand %p2166_p1, %p2156_p0 }
  0x1b   : > { %p2175_p8 = por %p2174_p7, %p2173_p4 }
  0x1c   : > { %p2169_p3 = pneg %p2168_p2 }
  0x1e   : > { %p2176_p12 = pnand %p2175_p8, %p2169_p3 }
  0x20   : > { %2179 = shalt.err (!%p2176_p12)
}
  0x21   : > { %1991 = dma.hbm_to_vmem [thread:$0]  (!%p2436_p13), %s3025_s3, 128, %s222_s11, [#allocation8]  }
  0x22   : > { %s2191_s20 = scalar_lea.vmem %s211_s13, 128  ;;  %p2199_p1 = scmp.lt.s32.totalorder %s211_s13, %s211_s13 }
  0x23   : > { %p2192_p9 = scmp.ne.s32.totalorder %s211_s13, %s2191_s20  ;;  %p2200_p2 = scmp.lt.s32.totalorder %s2191_s20, %s2191_s20 }
  0x25   : > { %p2194_p10 = pnand %p2192_p9, %p2156_p0  ;;  %p2201_p5 = por %p2200_p2, %p2199_p1 }
  0x27   : > { %p2195_p6 = pneg %p2194_p10 }
  0x29   : > { %p2202_p11 = pnand %p2201_p5, %p2195_p6 }
  0x2b   : > { %2205 = shalt.err (!%p2202_p11)
}
  0x2c   : > { %1988 = dma.hbm_to_vmem [thread:$0]  (!%p2436_p13), %s3024_s2, 128, %s211_s13, [#allocation5]  }
  0x2d   : > { %s2217_s29 = scalar_lea.vmem %s2440_s16, 2048  ;;  %p2225_p4 = scmp.lt.s32.totalorder %s2440_s16, %s2440_s16 }
  0x2e   : > { %p2218_p3 = scmp.ne.s32.totalorder %s2440_s16, %s2217_s29  ;;  %p2226_p5 = scmp.lt.s32.totalorder %s2217_s29, %s2217_s29 }
  0x30   : > { %p2220_p9 = pnand %p2218_p3, %p2156_p0  ;;  %p2227_p6 = por %p2226_p5, %p2225_p4 }
  0x32   : > { %p2221_p10 = pneg %p2220_p9 }
  0x34   : > { %p2228_p11 = pnand %p2227_p6, %p2221_p10 }
  0x36   : > { %2231 = shalt.err (!%p2228_p11)
}
  0x37   : > { %s2335_s10 = smov 128   ;;  %s2336_s11 = smov 8  }
  0x38   : > { %1994 = dma.hbm_to_vmem [thread:$0]  (!%p2436_p13), %s3026_s4, 2048, %s2440_s16, [#allocation8], %s2335_s10, %s2335_s10, %s2336_s11  }
  0x39   : > { %p3036_p7 = scmp.ne.s32.totalorder %s3034_s9, 0 }
  0x3a   : > { %p3037_p0 = scmp.eq.s32.totalorder (!%p3036_p7), %s2399_s25, 0 }
  0x3b   : > { %265 = sbr.rel (%p3036_p7) target bundleno = 3988 (0xf94), region = 40 }
  0x40   : > { %2301 = dma.done.wait (%p3037_p0), [#allocation5], 128   ;;  %p3038_p8 = pmov %p3037_p0 }
  0x41   : > { %p3039_p12 = pmov %p3037_p0 }
  0x42   : > { %2303 = vsyncadd (%p3038_p8), [#allocation5], 4294967168 }
  0x43   : > { %2305 = dma.done.wait (%p3039_p12), [#allocation8], 2176   ;;  %p3040_p1 = pmov %p3037_p0 }
  0x44   : > { %s2484_s13 = sand.u32 1, %s2322_s22   ;;  %s1814_s14 = sshll.u32 %s2399_s25, 4 }
  0x45   : > { %2307 = vsyncadd (%p3040_p1), [#allocation8], 4294965120  ;;  %s1812_s9 = sshll.u32 %s2484_s13, 7  ;;  %p314_p13 = scmp.lt.s32.totalorder %s1814_s14, 31 }
  0x46   : > { %s2498_s29 = scalar_lea.vmem [#allocation10], %s1812_s9  ;;  %s2500_s10 = scalar_lea.vmem [#allocation11], %s1812_s9 }
  0x47   : > { %s3050_s14 = smov (!%p314_p13, %s1814_s14), 31  ;;  %p3041_p2 = scmp.ne.s32.totalorder %s2399_s25, 0 }
  0x48   : > { %s1966_s16 = sshll.u32 %s3050_s14, 4  ;;  %s2491_s19 = scalar_lea.vmem %s3023_s1, %s3050_s14 }
  0x49   : > { %s2496_s28 = scalar_lea.vmem %s3022_s0, %s1966_s16  ;;  %331 = sbr.rel (%p3041_p2) target bundleno = 82 (0x52), region = 56 }
  0x4e   : > { %v332_v0 = vld [vmem:[#allocation4] sm:$0xff]  ;;  %v335_v1 = vld [vmem:[#allocation7] sm:$0xff] }
  0x4f   : > { %v333_v2 = vpack.c.bf16 %v332_v0, %v332_v0  ;;  %336 = vst [vmem:[#allocation3] sm:$0xff] %v335_v1 }
  0x51   : > { %334 = vst [vmem:[#allocation2] sm:$0xf] %v333_v2 }
  0x52 PF: > { %v2504_v3 = vld [vmem:[#allocation9 + $0x74] ss:$8 sps:$4 sm:$0xff]   ;;  %v2506_v4 = vld [vmem:[#allocation9 + $0x70] ss:$8 sps:$4 sm:$0xff]   ;;  %v2337_v5 = vmov 0   ;;  %v355_v21 = vld [vmem:[%s2496_s28] sm:$0xff] }
  0x53   : > { %469 = vmatprep.mubr.bf16.mxu0 %v2337_v5  ;;  %541 = vmatprep.mubr.bf16.mxu1 %v2337_v5  ;;  %v2511_v6 = vld [vmem:[#allocation9 + $0x64] ss:$8 sps:$4 sm:$0xff]   ;;  %v2515_v7 = vld [vmem:[#allocation9 + $0x60] ss:$8 sps:$4 sm:$0xff]   ;;  %v2519_v8 = vld [vmem:[#allocation9 + $0x54] ss:$8 sps:$4 sm:$0xff]  }
  0x54   : > { %437 = vmatprep.subr.bf16.mxu0 %v2504_v3  ;;  %509 = vmatprep.subr.bf16.mxu1 %v2504_v3  ;;  %v2523_v9 = vld [vmem:[#allocation9 + $0x50] ss:$8 sps:$4 sm:$0xff]   ;;  %v2527_v10 = vld [vmem:[#allocation9 + $0x44] ss:$8 sps:$4 sm:$0xff]   ;;  %v2531_v11 = vld [vmem:[#allocation9 + $0x40] ss:$8 sps:$4 sm:$0xff]  }
  0x55   : > { %438 = vmatpush1.bf16.msra.mxu0 %v2506_v4  ;;  %510 = vmatpush1.bf16.msra.mxu1 %v2506_v4  ;;  %v2535_v12 = vld [vmem:[#allocation9 + $0x34] ss:$8 sps:$4 sm:$0xff]   ;;  %v2539_v13 = vld [vmem:[#allocation9 + $0x30] ss:$8 sps:$4 sm:$0xff]   ;;  %v2543_v14 = vld [vmem:[#allocation9 + $0x24] ss:$8 sps:$4 sm:$0xff]  }
  0x56   : > { %439 = vmatprep.subr.bf16.mxu0 %v2511_v6  ;;  %511 = vmatprep.subr.bf16.mxu1 %v2511_v6  ;;  %v2547_v15 = vld [vmem:[#allocation9 + $0x20] ss:$8 sps:$4 sm:$0xff]   ;;  %v2551_v16 = vld [vmem:[#allocation9 + $0x14] ss:$8 sps:$4 sm:$0xff]   ;;  %v2555_v17 = vld [vmem:[#allocation9 + $0x10] ss:$8 sps:$4 sm:$0xff]  }
  0x57   : > { %v2559_v18 = vld [vmem:[#allocation9 + $0x4] ss:$8 sps:$4 sm:$0xff]   ;;  %v2563_v19 = vld [vmem:[#allocation9] ss:$8 sps:$4 sm:$0xff]   ;;  %v2338_v40 = vmov 0.0   ;;  %v1838_v44 = vld [vmem:[%s2496_s28 + $0x10] sm:$0xff] }
  0x58   : > { %v353_v20 = vld [vmem:[#allocation2] sm:$0xf]  ;;  %v356_v30 = vld [vmem:[%s2496_s28 + $0x8] sm:$0xff]  ;;  %v1839_v53 = vld [vmem:[%s2496_s28 + $0x18] sm:$0xff]  ;;  %s1967_s11 = sshll.u32 %s2399_s25, 11  ;;  %s1668_s12 = sshll.u32 %s2500_s10, 4  ;;  %s2938_s12 = int_to_ptr.vmem [resolvable:$true] %s1668_s12 }
  0x59   : > { %440 = vmatpush1.bf16.msra.mxu0 %v2515_v7  ;;  %512 = vmatpush1.bf16.msra.mxu1 %v2515_v7  ;;  %v354_v32 = vld [vmem:[#allocation3] sm:$0xff]  ;;  %v1836_v35 = vld [vmem:[%s2491_s19] ss:$0 sm:$0xff]  ;;  %v1842_v57 = vld [vmem:[%s2491_s19 + $0x1] ss:$0 sm:$0xff]  ;;  %s2936_s9 = scalar_lea.hbm %s3028_s6, %s1967_s11  ;;  %s1639_s17 = scalar_lea.sflag [#allocation12], %s2484_s13 }
  0x5a   : > { %441 = vmatprep.subr.bf16.mxu0 %v2519_v8  ;;  %513 = vmatprep.subr.bf16.mxu1 %v2519_v8  ;;  %vm497_vm0 = vcmp.eq.f32.partialorder %v1836_v35, 0.0  ;;  %vm570_vm2 = vcmp.eq.f32.partialorder %v1842_v57, 0.0  ;;  %v1846_v1 = vld [vmem:[%s2496_s28 + $0x20] sm:$0xff]  ;;  %s2232_s18 = scalar_lea.vmem %s2938_s12, 2048  ;;  %p3042_p9 = scmp.ne.s32.totalorder %s3032_s7, 0 }
  0x5b   : > { %p2233_p3 = scmp.ne.s32.totalorder %s2938_s12, %s2232_s18 }
  0x5d   : > { %442 = vmatpush1.bf16.msra.mxu0 %v2523_v9  ;;  %514 = vmatpush1.bf16.msra.mxu1 %v2523_v9  ;;  %p2234_p10 = pnand %p2233_p3, %p3042_p9 }
  0x5e   : > { %443 = vmatprep.subr.bf16.mxu0 %v2527_v10  ;;  %515 = vmatprep.subr.bf16.mxu1 %v2527_v10 }
  0x5f   : > { %p2235_p4 = pneg %p2234_p10 }
  0x61   : > { %444 = vmatpush1.bf16.msra.mxu0 %v2531_v11  ;;  %516 = vmatpush1.bf16.msra.mxu1 %v2531_v11 }
  0x62   : > { %445 = vmatprep.subr.bf16.mxu0 %v2535_v12  ;;  %517 = vmatprep.subr.bf16.mxu1 %v2535_v12 }
  0x65   : > { %446 = vmatpush1.bf16.msra.mxu0 %v2539_v13  ;;  %518 = vmatpush1.bf16.msra.mxu1 %v2539_v13 }
  0x66   : > { %447 = vmatprep.subr.bf16.mxu0 %v2543_v14  ;;  %519 = vmatprep.subr.bf16.mxu1 %v2543_v14 }
  0x69   : > { %448 = vmatpush1.bf16.msra.mxu0 %v2547_v15  ;;  %520 = vmatpush1.bf16.msra.mxu1 %v2547_v15 }
  0x6a   : > { %449 = vmatprep.subr.bf16.mxu0 %v2551_v16  ;;  %521 = vmatprep.subr.bf16.mxu1 %v2551_v16 }
  0x6d   : > { %450 = vmatpush1.bf16.msra.mxu0 %v2555_v17  ;;  %522 = vmatpush1.bf16.msra.mxu1 %v2555_v17 }
  0x6e   : > { %451 = vmatprep.subr.bf16.mxu0 %v2559_v18  ;;  %523 = vmatprep.subr.bf16.mxu1 %v2559_v18 }
  0x71   : > { %452 = vmatpush1.bf16.msra.mxu0 %v2563_v19  ;;  %524 = vmatpush1.bf16.msra.mxu1 %v2563_v19 }
  0x72   : > { %584 = vmatprep.subr.bf16.mxu0 %v2504_v3  ;;  %659 = vmatprep.subr.bf16.mxu1 %v2504_v3 }
  0x74   : > { %470 = vmatmul.mubr.bf16.vlgmr.msra.gmra.mxu0 %v353_v20 }
  0x75   : > { %585 = vmatpush1.bf16.msra.mxu0 %v2506_v4  ;;  %616 = vmatprep.mubr.bf16.mxu0 %v2337_v5 }
  0x76   : > { %586 = vmatprep.subr.bf16.mxu0 %v2511_v6 }
  0x79   : > { %587 = vmatpush1.bf16.msra.mxu0 %v2515_v7 }
  0x7a   : > { %588 = vmatprep.subr.bf16.mxu0 %v2519_v8 }
  0x7d   : > { %589 = vmatpush1.bf16.msra.mxu0 %v2523_v9 }
  0x7e   : > { %590 = vmatprep.subr.bf16.mxu0 %v2527_v10 }
  0x81   : > { %591 = vmatpush1.bf16.msra.mxu0 %v2531_v11 }
  0x82   : > { %592 = vmatprep.subr.bf16.mxu0 %v2535_v12 }
  0x85   : > { %593 = vmatpush1.bf16.msra.mxu0 %v2539_v13 }
  0x86   : > { %594 = vmatprep.subr.bf16.mxu0 %v2543_v14 }
  0x89   : > { %595 = vmatpush1.bf16.msra.mxu0 %v2547_v15 }
  0x8a   : > { %596 = vmatprep.subr.bf16.mxu0 %v2551_v16 }
  0x8d   : > { %597 = vmatpush1.bf16.msra.mxu0 %v2555_v17 }
  0x8e   : > { %598 = vmatprep.subr.bf16.mxu0 %v2559_v18 }
  0x91   : > { %599 = vmatpush1.bf16.msra.mxu0 %v2563_v19 }
  0x92   : > { %734 = vmatprep.subr.bf16.mxu0 %v2504_v3 }
 0x134   : > { %v471_v22 = vpop.f32.mrf.mxu0 }
 0x135   : > { %v478_v23 = vadd.f32 %v471_v22, %v355_v21 }
 0x136   : > { %v473_v24 = vpop.f32.mrf.mxu0 }
 0x137   : > { %v1835_v25 = vmul.f32 -1.442695, %v478_v23  ;;  %v479_v33 = vadd.f32 %v473_v24, %v356_v30 }
 0x138   : > { %v475_v26 = vpop.f32.mrf.mxu0 }
 0x139   : > { %2074 = vpow2.f32 %v1835_v25 }
 0x13a   : > { %v476_v27 = vpop.f32.mrf.mxu0 }
 0x13b   : > { %v1847_v27 = vld [vmem:[%s2496_s28 + $0x28] sm:$0xff] }
 0x146   : > { %v2075_v28 = vpop.eup %2074 }
 0x147   : > { %v483_v29 = vadd.f32 1.0, %v2075_v28 }
 0x149   : > { %2076 = vrcp.f32 %v483_v29 }
 0x156   : > { %v2077_v31 = vpop.eup %2076 }
 0x157   : > { %v487_v34 = vsub.f32 1.0, %v2077_v31  ;;  %v486_v36 = vmul.f32 %v2077_v31, %v354_v32  ;;  %v1850_v31 = vld [vmem:[%s2491_s19 + $0x2] ss:$0 sm:$0xff] }
 0x158   : > { %vm645_vm4 = vcmp.eq.f32.partialorder %v1850_v31, 0.0 }
 0x159   : > { %v488_v37 = vmul.f32 %v487_v34, %v479_v33 }
 0x15b   : > { %v489_v38 = vadd.f32 %v488_v37, %v486_v36 }
 0x15d   : > { %v498_v39 = vsel %vm497_vm0, %v354_v32, %v489_v38 }
 0x15e   : > { %vm499_vm1 = vcmp.ge.f32.partialorder %v498_v39, 0.0  ;;  %504 = vst [vmem:[%s2500_s10] sm:$0xff] %v498_v39 }
 0x15f   : > { %v1837_v41 = vsel %vm499_vm1, 1.0, %v2338_v40 }
 0x160   : > { %v502_v42 = vmul.f32 %v1837_v41, %v1836_v35 }
 0x162   : > { %503 = vst [vmem:[%s2498_s29] sm:$0xff] %v502_v42  ;;  %v505_v43 = vpack.c.bf16 %v502_v42, %v502_v42 }
 0x164   : > { %542 = vmatmul.mubr.bf16.vlgmr.msra.gmra.mxu1 %v505_v43 }
 0x165   : > { %660 = vmatpush1.bf16.msra.mxu1 %v2506_v4  ;;  %691 = vmatprep.mubr.bf16.mxu1 %v2337_v5 }
 0x166   : > { %661 = vmatprep.subr.bf16.mxu1 %v2511_v6 }
 0x169   : > { %662 = vmatpush1.bf16.msra.mxu1 %v2515_v7 }
 0x16a   : > { %663 = vmatprep.subr.bf16.mxu1 %v2519_v8 }
 0x16d   : > { %664 = vmatpush1.bf16.msra.mxu1 %v2523_v9 }
 0x16e   : > { %665 = vmatprep.subr.bf16.mxu1 %v2527_v10 }
 0x171   : > { %666 = vmatpush1.bf16.msra.mxu1 %v2531_v11 }
 0x172   : > { %667 = vmatprep.subr.bf16.mxu1 %v2535_v12 }
 0x175   : > { %668 = vmatpush1.bf16.msra.mxu1 %v2539_v13 }
 0x176   : > { %669 = vmatprep.subr.bf16.mxu1 %v2543_v14 }
 0x179   : > { %670 = vmatpush1.bf16.msra.mxu1 %v2547_v15 }
 0x17a   : > { %671 = vmatprep.subr.bf16.mxu1 %v2551_v16 }
 0x17d   : > { %672 = vmatpush1.bf16.msra.mxu1 %v2555_v17 }
 0x17e   : > { %673 = vmatprep.subr.bf16.mxu1 %v2559_v18 }
 0x181   : > { %674 = vmatpush1.bf16.msra.mxu1 %v2563_v19 }
 0x182   : > { %809 = vmatprep.subr.bf16.mxu1 %v2504_v3 }
 0x224   : > { %v543_v45 = vpop.f32.mrf.mxu1 }
 0x225   : > { %v550_v46 = vadd.f32 %v1838_v44, %v543_v45 }
 0x226   : > { %v545_v47 = vpop.f32.mrf.mxu1 }
 0x227   : > { %v1840_v48 = vmul.f32 -1.442695, %v550_v46  ;;  %v551_v55 = vadd.f32 %v1839_v53, %v545_v47  ;;  %v1858_v53 = vld [vmem:[%s2491_s19 + $0x3] ss:$0 sm:$0xff] }
 0x228   : > { %v547_v49 = vpop.f32.mrf.mxu1  ;;  %vm720_vm6 = vcmp.eq.f32.partialorder %v1858_v53, 0.0 }
 0x229   : > { %2078 = vpow2.f32 %v1840_v48  ;;  %v1855_v49 = vld [vmem:[%s2496_s28 + $0x38] sm:$0xff] }
 0x22a   : > { %v548_v50 = vpop.f32.mrf.mxu1 }
 0x236   : > { %v2079_v51 = vpop.eup %2078 }
 0x237   : > { %v555_v52 = vadd.f32 1.0, %v2079_v51 }
 0x239   : > { %2080 = vrcp.f32 %v555_v52 }
 0x246   : > { %v2081_v54 = vpop.eup %2080 }
 0x247   : > { %v559_v56 = vsub.f32 1.0, %v2081_v54  ;;  %v558_v58 = vmul.f32 %v2081_v54, %v498_v39 }
 0x249   : > { %v560_v59 = vmul.f32 %v559_v56, %v551_v55 }
 0x24b   : > { %v561_v60 = vadd.f32 %v560_v59, %v558_v58 }
 0x24d   : > { %v571_v61 = vsel %vm570_vm2, %v498_v39, %v561_v60  ;;  %v1854_v39 = vld [vmem:[%s2496_s28 + $0x30] sm:$0xff] }
 0x24e   : > { %1845 = vst [vmem:[%s2500_s10 + $0x8] sm:$0xff] %v571_v61  ;;  %vm572_vm3 = vcmp.ge.f32.partialorder %v571_v61, 0.0 }
 0x24f   : > { %v1843_v62 = vsel %vm572_vm3, 1.0, %v2338_v40 }
 0x250   : > { %v575_v63 = vmul.f32 %v1843_v62, %v1842_v57 }
 0x252   : > { %1844 = vst [vmem:[%s2498_s29 + $0x8] sm:$0xff] %v575_v63  ;;  %v580_v0 = vpack.c.bf16 %v575_v63, %v575_v63 }
 0x254   : > { %617 = vmatmul.mubr.bf16.vlgmr.msra.gmra.mxu0 %v580_v0 }
 0x255   : > { %735 = vmatpush1.bf16.msra.mxu0 %v2506_v4  ;;  %766 = vmatprep.mubr.bf16.mxu0 %v2337_v5 }
 0x256   : > { %736 = vmatprep.subr.bf16.mxu0 %v2511_v6 }
 0x259   : > { %737 = vmatpush1.bf16.msra.mxu0 %v2515_v7 }
 0x25a   : > { %738 = vmatprep.subr.bf16.mxu0 %v2519_v8 }
 0x25d   : > { %739 = vmatpush1.bf16.msra.mxu0 %v2523_v9 }
 0x25e   : > { %740 = vmatprep.subr.bf16.mxu0 %v2527_v10 }
 0x261   : > { %741 = vmatpush1.bf16.msra.mxu0 %v2531_v11 }
 0x262   : > { %742 = vmatprep.subr.bf16.mxu0 %v2535_v12 }
 0x265   : > { %743 = vmatpush1.bf16.msra.mxu0 %v2539_v13 }
 0x266   : > { %744 = vmatprep.subr.bf16.mxu0 %v2543_v14 }
 0x269   : > { %745 = vmatpush1.bf16.msra.mxu0 %v2547_v15 }
 0x26a   : > { %746 = vmatprep.subr.bf16.mxu0 %v2551_v16 }
 0x26d   : > { %747 = vmatpush1.bf16.msra.mxu0 %v2555_v17 }
 0x26e   : > { %748 = vmatprep.subr.bf16.mxu0 %v2559_v18 }
 0x271   : > { %749 = vmatpush1.bf16.msra.mxu0 %v2563_v19 }
 0x272   : > { %884 = vmatprep.subr.bf16.mxu0 %v2504_v3 }
 0x314   : > { %v618_v2 = vpop.f32.mrf.mxu0 }
 0x315   : > { %v625_v20 = vadd.f32 %v1846_v1, %v618_v2 }
 0x316   : > { %v620_v21 = vpop.f32.mrf.mxu0 }
 0x317   : > { %v1848_v22 = vmul.f32 -1.442695, %v625_v20  ;;  %v626_v29 = vadd.f32 %v1847_v27, %v620_v21  ;;  %v1866_v27 = vld [vmem:[%s2491_s19 + $0x4] ss:$0 sm:$0xff] }
 0x318   : > { %v622_v23 = vpop.f32.mrf.mxu0  ;;  %vm795_vm8 = vcmp.eq.f32.partialorder %v1866_v27, 0.0 }
 0x319   : > { %2082 = vpow2.f32 %v1848_v22  ;;  %v1863_v23 = vld [vmem:[%s2496_s28 + $0x48] sm:$0xff] }
 0x31a   : > { %v623_v24 = vpop.f32.mrf.mxu0 }
 0x326   : > { %v2083_v25 = vpop.eup %2082 }
 0x327   : > { %v630_v26 = vadd.f32 1.0, %v2083_v25 }
 0x329   : > { %2084 = vrcp.f32 %v630_v26 }
 0x336   : > { %v2085_v28 = vpop.eup %2084 }
 0x337   : > { %v634_v30 = vsub.f32 1.0, %v2085_v28  ;;  %v633_v32 = vmul.f32 %v2085_v28, %v571_v61 }
 0x339   : > { %v635_v33 = vmul.f32 %v634_v30, %v626_v29 }
 0x33b   : > { %v636_v34 = vadd.f32 %v635_v33, %v633_v32 }
 0x33d   : > { %v646_v35 = vsel %vm645_vm4, %v571_v61, %v636_v34  ;;  %v1862_v61 = vld [vmem:[%s2496_s28 + $0x40] sm:$0xff] }
 0x33e   : > { %1853 = vst [vmem:[%s2500_s10 + $0x10] sm:$0xff] %v646_v35  ;;  %vm647_vm5 = vcmp.ge.f32.partialorder %v646_v35, 0.0 }
 0x33f   : > { %v1851_v36 = vsel %vm647_vm5, 1.0, %v2338_v40 }
 0x340   : > { %v650_v37 = vmul.f32 %v1851_v36, %v1850_v31 }
 0x342   : > { %1852 = vst [vmem:[%s2498_s29 + $0x10] sm:$0xff] %v650_v37  ;;  %v655_v38 = vpack.c.bf16 %v650_v37, %v650_v37 }
 0x344   : > { %692 = vmatmul.mubr.bf16.vlgmr.msra.gmra.mxu1 %v655_v38 }
 0x345   : > { %810 = vmatpush1.bf16.msra.mxu1 %v2506_v4  ;;  %841 = vmatprep.mubr.bf16.mxu1 %v2337_v5 }
 0x346   : > { %811 = vmatprep.subr.bf16.mxu1 %v2511_v6 }
 0x349   : > { %812 = vmatpush1.bf16.msra.mxu1 %v2515_v7 }
 0x34a   : > { %813 = vmatprep.subr.bf16.mxu1 %v2519_v8 }
 0x34d   : > { %814 = vmatpush1.bf16.msra.mxu1 %v2523_v9 }
 0x34e   : > { %815 = vmatprep.subr.bf16.mxu1 %v2527_v10 }
 0x351   : > { %816 = vmatpush1.bf16.msra.mxu1 %v2531_v11 }
 0x352   : > { %817 = vmatprep.subr.bf16.mxu1 %v2535_v12 }
 0x355   : > { %818 = vmatpush1.bf16.msra.mxu1 %v2539_v13 }
 0x356   : > { %819 = vmatprep.subr.bf16.mxu1 %v2543_v14 }
 0x359   : > { %820 = vmatpush1.bf16.msra.mxu1 %v2547_v15 }
 0x35a   : > { %821 = vmatprep.subr.bf16.mxu1 %v2551_v16 }
 0x35d   : > { %822 = vmatpush1.bf16.msra.mxu1 %v2555_v17 }
 0x35e   : > { %823 = vmatprep.subr.bf16.mxu1 %v2559_v18 }
 0x361   : > { %824 = vmatpush1.bf16.msra.mxu1 %v2563_v19 }
 0x362   : > { %959 = vmatprep.subr.bf16.mxu1 %v2504_v3 }
 0x404   : > { %v693_v41 = vpop.f32.mrf.mxu1 }
 0x405   : > { %v700_v42 = vadd.f32 %v1854_v39, %v693_v41 }
 0x406   : > { %v695_v43 = vpop.f32.mrf.mxu1 }
 0x407   : > { %v1856_v44 = vmul.f32 -1.442695, %v700_v42  ;;  %v701_v51 = vadd.f32 %v1855_v49, %v695_v43  ;;  %v1874_v49 = vld [vmem:[%s2491_s19 + $0x5] ss:$0 sm:$0xff] }
 0x408   : > { %v697_v45 = vpop.f32.mrf.mxu1  ;;  %vm870_vm10 = vcmp.eq.f32.partialorder %v1874_v49, 0.0 }
 0x409   : > { %2086 = vpow2.f32 %v1856_v44  ;;  %v1871_v45 = vld [vmem:[%s2496_s28 + $0x58] sm:$0xff] }
 0x40a   : > { %v698_v46 = vpop.f32.mrf.mxu1 }
 0x416   : > { %v2087_v47 = vpop.eup %2086 }
 0x417   : > { %v705_v48 = vadd.f32 1.0, %v2087_v47 }
 0x419   : > { %2088 = vrcp.f32 %v705_v48 }
 0x426   : > { %v2089_v50 = vpop.eup %2088 }
 0x427   : > { %v709_v52 = vsub.f32 1.0, %v2089_v50  ;;  %v708_v54 = vmul.f32 %v2089_v50, %v646_v35 }
 0x429   : > { %v710_v55 = vmul.f32 %v709_v52, %v701_v51 }
 0x42b   : > { %v711_v56 = vadd.f32 %v710_v55, %v708_v54 }
 0x42d   : > { %v721_v57 = vsel %vm720_vm6, %v646_v35, %v711_v56  ;;  %v1870_v35 = vld [vmem:[%s2496_s28 + $0x50] sm:$0xff] }
 0x42e   : > { %1861 = vst [vmem:[%s2500_s10 + $0x18] sm:$0xff] %v721_v57  ;;  %vm722_vm7 = vcmp.ge.f32.partialorder %v721_v57, 0.0 }
 0x42f   : > { %v1859_v58 = vsel %vm722_vm7, 1.0, %v2338_v40 }
 0x430   : > { %v725_v59 = vmul.f32 %v1859_v58, %v1858_v53 }
 0x432   : > { %1860 = vst [vmem:[%s2498_s29 + $0x18] sm:$0xff] %v725_v59  ;;  %v730_v60 = vpack.c.bf16 %v725_v59, %v725_v59 }
 0x434   : > { %767 = vmatmul.mubr.bf16.vlgmr.msra.gmra.mxu0 %v730_v60 }
 0x435   : > { %885 = vmatpush1.bf16.msra.mxu0 %v2506_v4  ;;  %916 = vmatprep.mubr.bf16.mxu0 %v2337_v5 }
 0x436   : > { %886 = vmatprep.subr.bf16.mxu0 %v2511_v6 }
 0x439   : > { %887 = vmatpush1.bf16.msra.mxu0 %v2515_v7 }
 0x43a   : > { %888 = vmatprep.subr.bf16.mxu0 %v2519_v8 }
 0x43d   : > { %889 = vmatpush1.bf16.msra.mxu0 %v2523_v9 }
 0x43e   : > { %890 = vmatprep.subr.bf16.mxu0 %v2527_v10 }
 0x441   : > { %891 = vmatpush1.bf16.msra.mxu0 %v2531_v11 }
 0x442   : > { %892 = vmatprep.subr.bf16.mxu0 %v2535_v12 }
 0x445   : > { %893 = vmatpush1.bf16.msra.mxu0 %v2539_v13 }
 0x446   : > { %894 = vmatprep.subr.bf16.mxu0 %v2543_v14 }
 0x449   : > { %895 = vmatpush1.bf16.msra.mxu0 %v2547_v15 }
 0x44a   : > { %896 = vmatprep.subr.bf16.mxu0 %v2551_v16 }
 0x44d   : > { %897 = vmatpush1.bf16.msra.mxu0 %v2555_v17 }
 0x44e   : > { %898 = vmatprep.subr.bf16.mxu0 %v2559_v18 }
 0x451   : > { %899 = vmatpush1.bf16.msra.mxu0 %v2563_v19 }
 0x452   : > { %1034 = vmatprep.subr.bf16.mxu0 %v2504_v3 }
 0x4f4   : > { %v768_v62 = vpop.f32.mrf.mxu0 }
 0x4f5   : > { %v775_v63 = vadd.f32 %v1862_v61, %v768_v62 }
 0x4f6   : > { %v770_v0 = vpop.f32.mrf.mxu0 }
 0x4f7   : > { %v1864_v1 = vmul.f32 -1.442695, %v775_v63  ;;  %v776_v25 = vadd.f32 %v1863_v23, %v770_v0  ;;  %v1882_v23 = vld [vmem:[%s2491_s19 + $0x6] ss:$0 sm:$0xff] }
 0x4f8   : > { %v772_v2 = vpop.f32.mrf.mxu0  ;;  %vm945_vm12 = vcmp.eq.f32.partialorder %v1882_v23, 0.0 }
 0x4f9   : > { %2090 = vpow2.f32 %v1864_v1  ;;  %v1879_v2 = vld [vmem:[%s2496_s28 + $0x68] sm:$0xff] }
 0x4fa   : > { %v773_v20 = vpop.f32.mrf.mxu0 }
 0x506   : > { %v2091_v21 = vpop.eup %2090 }
 0x507   : > { %v780_v22 = vadd.f32 1.0, %v2091_v21 }
 0x509   : > { %2092 = vrcp.f32 %v780_v22 }
 0x516   : > { %v2093_v24 = vpop.eup %2092 }
 0x517   : > { %v784_v26 = vsub.f32 1.0, %v2093_v24  ;;  %v783_v28 = vmul.f32 %v2093_v24, %v721_v57 }
 0x519   : > { %v785_v29 = vmul.f32 %v784_v26, %v776_v25 }
 0x51b   : > { %v786_v30 = vadd.f32 %v785_v29, %v783_v28 }
 0x51d   : > { %v796_v31 = vsel %vm795_vm8, %v721_v57, %v786_v30  ;;  %v1878_v57 = vld [vmem:[%s2496_s28 + $0x60] sm:$0xff] }
 0x51e   : > { %1869 = vst [vmem:[%s2500_s10 + $0x20] sm:$0xff] %v796_v31  ;;  %vm797_vm9 = vcmp.ge.f32.partialorder %v796_v31, 0.0 }
 0x51f   : > { %v1867_v32 = vsel %vm797_vm9, 1.0, %v2338_v40 }
 0x520   : > { %v800_v33 = vmul.f32 %v1867_v32, %v1866_v27 }
 0x522   : > { %1868 = vst [vmem:[%s2498_s29 + $0x20] sm:$0xff] %v800_v33  ;;  %v805_v34 = vpack.c.bf16 %v800_v33, %v800_v33 }
 0x524   : > { %842 = vmatmul.mubr.bf16.vlgmr.msra.gmra.mxu1 %v805_v34 }
 0x525   : > { %960 = vmatpush1.bf16.msra.mxu1 %v2506_v4  ;;  %991 = vmatprep.mubr.bf16.mxu1 %v2337_v5 }
 0x526   : > { %961 = vmatprep.subr.bf16.mxu1 %v2511_v6 }
 0x529   : > { %962 = vmatpush1.bf16.msra.mxu1 %v2515_v7 }
 0x52a   : > { %963 = vmatprep.subr.bf16.mxu1 %v2519_v8 }
 0x52d   : > { %964 = vmatpush1.bf16.msra.mxu1 %v2523_v9 }
 0x52e   : > { %965 = vmatprep.subr.bf16.mxu1 %v2527_v10 }
 0x531   : > { %966 = vmatpush1.bf16.msra.mxu1 %v2531_v11 }
 0x532   : > { %967 = vmatprep.subr.bf16.mxu1 %v2535_v12 }
 0x535   : > { %968 = vmatpush1.bf16.msra.mxu1 %v2539_v13 }
 0x536   : > { %969 = vmatprep.subr.bf16.mxu1 %v2543_v14 }
 0x539   : > { %970 = vmatpush1.bf16.msra.mxu1 %v2547_v15 }
 0x53a   : > { %971 = vmatprep.subr.bf16.mxu1 %v2551_v16 }
 0x53d   : > { %972 = vmatpush1.bf16.msra.mxu1 %v2555_v17 }
 0x53e   : > { %973 = vmatprep.subr.bf16.mxu1 %v2559_v18 }
 0x541   : > { %974 = vmatpush1.bf16.msra.mxu1 %v2563_v19 }
 0x542   : > { %1109 = vmatprep.subr.bf16.mxu1 %v2504_v3 }
 0x5e4   : > { %v843_v36 = vpop.f32.mrf.mxu1 }
 0x5e5   : > { %v850_v37 = vadd.f32 %v1870_v35, %v843_v36 }
 0x5e6   : > { %v845_v38 = vpop.f32.mrf.mxu1 }
 0x5e7   : > { %v1872_v39 = vmul.f32 -1.442695, %v850_v37  ;;  %v851_v47 = vadd.f32 %v1871_v45, %v845_v38  ;;  %v1890_v45 = vld [vmem:[%s2491_s19 + $0x7] ss:$0 sm:$0xff] }
 0x5e8   : > { %v847_v41 = vpop.f32.mrf.mxu1  ;;  %vm1020_vm14 = vcmp.eq.f32.partialorder %v1890_v45, 0.0 }
 0x5e9   : > { %2094 = vpow2.f32 %v1872_v39  ;;  %v1887_v41 = vld [vmem:[%s2496_s28 + $0x78] sm:$0xff] }
 0x5ea   : > { %v848_v42 = vpop.f32.mrf.mxu1 }
 0x5f6   : > { %v2095_v43 = vpop.eup %2094 }
 0x5f7   : > { %v855_v44 = vadd.f32 1.0, %v2095_v43 }
 0x5f9   : > { %2096 = vrcp.f32 %v855_v44 }
 0x606   : > { %v2097_v46 = vpop.eup %2096 }
 0x607   : > { %v859_v48 = vsub.f32 1.0, %v2097_v46  ;;  %v858_v50 = vmul.f32 %v2097_v46, %v796_v31 }
 0x609   : > { %v860_v51 = vmul.f32 %v859_v48, %v851_v47 }
 0x60b   : > { %v861_v52 = vadd.f32 %v860_v51, %v858_v50 }
 0x60d   : > { %v871_v53 = vsel %vm870_vm10, %v796_v31, %v861_v52  ;;  %v1886_v31 = vld [vmem:[%s2496_s28 + $0x70] sm:$0xff] }
 0x60e   : > { %1877 = vst [vmem:[%s2500_s10 + $0x28] sm:$0xff] %v871_v53  ;;  %vm872_vm11 = vcmp.ge.f32.partialorder %v871_v53, 0.0 }
 0x60f   : > { %v1875_v54 = vsel %vm872_vm11, 1.0, %v2338_v40 }
 0x610   : > { %v875_v55 = vmul.f32 %v1875_v54, %v1874_v49 }
 0x612   : > { %1876 = vst [vmem:[%s2498_s29 + $0x28] sm:$0xff] %v875_v55  ;;  %v880_v56 = vpack.c.bf16 %v875_v55, %v875_v55 }
 0x614   : > { %917 = vmatmul.mubr.bf16.vlgmr.msra.gmra.mxu0 %v880_v56 }
 0x615   : > { %1035 = vmatpush1.bf16.msra.mxu0 %v2506_v4  ;;  %1066 = vmatprep.mubr.bf16.mxu0 %v2337_v5 }
 0x616   : > { %1036 = vmatprep.subr.bf16.mxu0 %v2511_v6 }
 0x619   : > { %1037 = vmatpush1.bf16.msra.mxu0 %v2515_v7 }
 0x61a   : > { %1038 = vmatprep.subr.bf16.mxu0 %v2519_v8 }
 0x61d   : > { %1039 = vmatpush1.bf16.msra.mxu0 %v2523_v9 }
 0x61e   : > { %1040 = vmatprep.subr.bf16.mxu0 %v2527_v10 }
 0x621   : > { %1041 = vmatpush1.bf16.msra.mxu0 %v2531_v11 }
 0x622   : > { %1042 = vmatprep.subr.bf16.mxu0 %v2535_v12 }
 0x625   : > { %1043 = vmatpush1.bf16.msra.mxu0 %v2539_v13 }
 0x626   : > { %1044 = vmatprep.subr.bf16.mxu0 %v2543_v14 }
 0x629   : > { %1045 = vmatpush1.bf16.msra.mxu0 %v2547_v15 }
 0x62a   : > { %1046 = vmatprep.subr.bf16.mxu0 %v2551_v16 }
 0x62d   : > { %1047 = vmatpush1.bf16.msra.mxu0 %v2555_v17 }
 0x62e   : > { %1048 = vmatprep.subr.bf16.mxu0 %v2559_v18 }
 0x631   : > { %1049 = vmatpush1.bf16.msra.mxu0 %v2563_v19 }
 0x632   : > { %1184 = vmatprep.subr.bf16.mxu0 %v2504_v3 }
 0x6d4   : > { %v918_v58 = vpop.f32.mrf.mxu0 }
 0x6d5   : > { %v925_v59 = vadd.f32 %v1878_v57, %v918_v58 }
 0x6d6   : > { %v920_v60 = vpop.f32.mrf.mxu0 }
 0x6d7   : > { %v1880_v61 = vmul.f32 -1.442695, %v925_v59  ;;  %v926_v21 = vadd.f32 %v1879_v2, %v920_v60  ;;  %v1898_v2 = vld [vmem:[%s2491_s19 + $0x8] ss:$0 sm:$0xff] }
 0x6d8   : > { %v922_v62 = vpop.f32.mrf.mxu0  ;;  %vm1095_vm0 = vcmp.eq.f32.partialorder %v1898_v2, 0.0 }
 0x6d9   : > { %2098 = vpow2.f32 %v1880_v61  ;;  %v1895_v62 = vld [vmem:[%s2496_s28 + $0x88] sm:$0xff] }
 0x6da   : > { %v923_v63 = vpop.f32.mrf.mxu0 }
 0x6e6   : > { %v2099_v0 = vpop.eup %2098 }
 0x6e7   : > { %v930_v1 = vadd.f32 1.0, %v2099_v0 }
 0x6e9   : > { %2100 = vrcp.f32 %v930_v1 }
 0x6f6   : > { %v2101_v20 = vpop.eup %2100 }
 0x6f7   : > { %v934_v22 = vsub.f32 1.0, %v2101_v20  ;;  %v933_v24 = vmul.f32 %v2101_v20, %v871_v53 }
 0x6f9   : > { %v935_v25 = vmul.f32 %v934_v22, %v926_v21 }
 0x6fb   : > { %v936_v26 = vadd.f32 %v935_v25, %v933_v24 }
 0x6fd   : > { %v946_v27 = vsel %vm945_vm12, %v871_v53, %v936_v26  ;;  %v1894_v53 = vld [vmem:[%s2496_s28 + $0x80] sm:$0xff] }
 0x6fe   : > { %1885 = vst [vmem:[%s2500_s10 + $0x30] sm:$0xff] %v946_v27  ;;  %vm947_vm13 = vcmp.ge.f32.partialorder %v946_v27, 0.0 }
 0x6ff   : > { %v1883_v28 = vsel %vm947_vm13, 1.0, %v2338_v40 }
 0x700   : > { %v950_v29 = vmul.f32 %v1883_v28, %v1882_v23 }
 0x702   : > { %1884 = vst [vmem:[%s2498_s29 + $0x30] sm:$0xff] %v950_v29  ;;  %v955_v30 = vpack.c.bf16 %v950_v29, %v950_v29 }
 0x704   : > { %992 = vmatmul.mubr.bf16.vlgmr.msra.gmra.mxu1 %v955_v30 }
 0x705   : > { %1110 = vmatpush1.bf16.msra.mxu1 %v2506_v4  ;;  %1141 = vmatprep.mubr.bf16.mxu1 %v2337_v5 }
 0x706   : > { %1111 = vmatprep.subr.bf16.mxu1 %v2511_v6 }
 0x709   : > { %1112 = vmatpush1.bf16.msra.mxu1 %v2515_v7 }
 0x70a   : > { %1113 = vmatprep.subr.bf16.mxu1 %v2519_v8 }
 0x70d   : > { %1114 = vmatpush1.bf16.msra.mxu1 %v2523_v9 }
 0x70e   : > { %1115 = vmatprep.subr.bf16.mxu1 %v2527_v10 }
 0x711   : > { %1116 = vmatpush1.bf16.msra.mxu1 %v2531_v11 }
 0x712   : > { %1117 = vmatprep.subr.bf16.mxu1 %v2535_v12 }
 0x715   : > { %1118 = vmatpush1.bf16.msra.mxu1 %v2539_v13 }
 0x716   : > { %1119 = vmatprep.subr.bf16.mxu1 %v2543_v14 }
 0x719   : > { %1120 = vmatpush1.bf16.msra.mxu1 %v2547_v15 }
 0x71a   : > { %1121 = vmatprep.subr.bf16.mxu1 %v2551_v16 }
 0x71d   : > { %1122 = vmatpush1.bf16.msra.mxu1 %v2555_v17 }
 0x71e   : > { %1123 = vmatprep.subr.bf16.mxu1 %v2559_v18 }
 0x721   : > { %1124 = vmatpush1.bf16.msra.mxu1 %v2563_v19 }
 0x722   : > { %1259 = vmatprep.subr.bf16.mxu1 %v2504_v3 }
 0x7c4   : > { %v993_v32 = vpop.f32.mrf.mxu1 }
 0x7c5   : > { %v1000_v33 = vadd.f32 %v1886_v31, %v993_v32 }
 0x7c6   : > { %v995_v34 = vpop.f32.mrf.mxu1 }
 0x7c7   : > { %v1888_v35 = vmul.f32 -1.442695, %v1000_v33  ;;  %v1001_v43 = vadd.f32 %v1887_v41, %v995_v34  ;;  %v1903_v33 = vld [vmem:[%s2496_s28 + $0x98] sm:$0xff] }
 0x7c8   : > { %v997_v36 = vpop.f32.mrf.mxu1 }
 0x7c9   : > { %2102 = vpow2.f32 %v1888_v35 }
 0x7ca   : > { %v998_v37 = vpop.f32.mrf.mxu1 }
 0x7cb   : > { %v1906_v37 = vld [vmem:[%s2491_s19 + $0x9] ss:$0 sm:$0xff] }
 0x7cc   : > { %vm1170_vm2 = vcmp.eq.f32.partialorder %v1906_v37, 0.0 }
 0x7d6   : > { %v2103_v38 = vpop.eup %2102 }
 0x7d7   : > { %v1005_v39 = vadd.f32 1.0, %v2103_v38 }
 0x7d9   : > { %2104 = vrcp.f32 %v1005_v39 }
 0x7e6   : > { %v2105_v42 = vpop.eup %2104 }
 0x7e7   : > { %v1009_v44 = vsub.f32 1.0, %v2105_v42  ;;  %v1008_v46 = vmul.f32 %v2105_v42, %v946_v27 }
 0x7e9   : > { %v1010_v47 = vmul.f32 %v1009_v44, %v1001_v43 }
 0x7eb   : > { %v1011_v48 = vadd.f32 %v1010_v47, %v1008_v46  ;;  %v2806_v46 = vld [vmem:[#allocation9 + $0x64] ss:$8 sps:$4 sm:$0xff]   ;;  %v2809_v47 = vld [vmem:[#allocation9 + $0x60] ss:$8 sps:$4 sm:$0xff]  }
 0x7ed   : > { %v1021_v49 = vsel %vm1020_vm14, %v946_v27, %v1011_v48 }
 0x7ee   : > { %1893 = vst [vmem:[%s2500_s10 + $0x38] sm:$0xff] %v1021_v49  ;;  %vm1022_vm15 = vcmp.ge.f32.partialorder %v1021_v49, 0.0 }
 0x7ef   : > { %v1891_v50 = vsel %vm1022_vm15, 1.0, %v2338_v40 }
 0x7f0   : > { %v1025_v51 = vmul.f32 %v1891_v50, %v1890_v45  ;;  %v2802_v45 = vld [vmem:[#allocation9 + $0x70] ss:$8 sps:$4 sm:$0xff]   ;;  %v1914_v50 = vld [vmem:[%s2491_s19 + $0xa] ss:$0 sm:$0xff] }
 0x7f1   : > { %vm1245_vm4 = vcmp.eq.f32.partialorder %v1914_v50, 0.0 }
 0x7f2   : > { %1892 = vst [vmem:[%s2498_s29 + $0x38] sm:$0xff] %v1025_v51  ;;  %v1030_v52 = vpack.c.bf16 %v1025_v51, %v1025_v51 }
 0x7f4   : > { %1067 = vmatmul.mubr.bf16.vlgmr.msra.gmra.mxu0 %v1030_v52 }
 0x7f5   : > { %1185 = vmatpush1.bf16.msra.mxu0 %v2506_v4  ;;  %1216 = vmatprep.mubr.bf16.mxu0 %v2337_v5 }
 0x7f6   : > { %1186 = vmatprep.subr.bf16.mxu0 %v2511_v6 }
 0x7f9   : > { %1187 = vmatpush1.bf16.msra.mxu0 %v2515_v7 }
 0x7fa   : > { %1188 = vmatprep.subr.bf16.mxu0 %v2519_v8 }
 0x7fd   : > { %1189 = vmatpush1.bf16.msra.mxu0 %v2523_v9 }
 0x7fe   : > { %1190 = vmatprep.subr.bf16.mxu0 %v2527_v10 }
 0x801   : > { %1191 = vmatpush1.bf16.msra.mxu0 %v2531_v11 }
 0x802   : > { %1192 = vmatprep.subr.bf16.mxu0 %v2535_v12 }
 0x805   : > { %1193 = vmatpush1.bf16.msra.mxu0 %v2539_v13 }
 0x806   : > { %1194 = vmatprep.subr.bf16.mxu0 %v2543_v14 }
 0x809   : > { %1195 = vmatpush1.bf16.msra.mxu0 %v2547_v15 }
 0x80a   : > { %1196 = vmatprep.subr.bf16.mxu0 %v2551_v16 }
 0x80d   : > { %1197 = vmatpush1.bf16.msra.mxu0 %v2555_v17 }
 0x80e   : > { %1198 = vmatprep.subr.bf16.mxu0 %v2559_v18 }
 0x811   : > { %1199 = vmatpush1.bf16.msra.mxu0 %v2563_v19 }
 0x812   : > { %1334 = vmatprep.subr.bf16.mxu0 %v2504_v3 }
 0x8b4   : > { %v1068_v54 = vpop.f32.mrf.mxu0 }
 0x8b5   : > { %v1075_v55 = vadd.f32 %v1894_v53, %v1068_v54 }
 0x8b6   : > { %v1070_v56 = vpop.f32.mrf.mxu0 }
 0x8b7   : > { %v1896_v57 = vmul.f32 -1.442695, %v1075_v55  ;;  %v1076_v0 = vadd.f32 %v1895_v62, %v1070_v56  ;;  %v2846_v62 = vld [vmem:[#allocation9 + $0x34] ss:$8 sps:$4 sm:$0xff]  }
 0x8b8   : > { %v1072_v58 = vpop.f32.mrf.mxu0 }
 0x8b9   : > { %2106 = vpow2.f32 %v1896_v57  ;;  %v2834_v58 = vld [vmem:[#allocation9 + $0x54] ss:$8 sps:$4 sm:$0xff]  }
 0x8ba   : > { %v1073_v59 = vpop.f32.mrf.mxu0 }
 0x8bb   : > { %v2837_v59 = vld [vmem:[#allocation9 + $0x50] ss:$8 sps:$4 sm:$0xff]  }
 0x8c6   : > { %v2107_v60 = vpop.eup %2106 }
 0x8c7   : > { %v1080_v61 = vadd.f32 1.0, %v2107_v60  ;;  %v2840_v60 = vld [vmem:[#allocation9 + $0x44] ss:$8 sps:$4 sm:$0xff]  }
 0x8c9   : > { %2108 = vrcp.f32 %v1080_v61  ;;  %v2843_v61 = vld [vmem:[#allocation9 + $0x40] ss:$8 sps:$4 sm:$0xff]  }
 0x8d6   : > { %v2109_v63 = vpop.eup %2108 }
 0x8d7   : > { %v1084_v1 = vsub.f32 1.0, %v2109_v63  ;;  %v1083_v20 = vmul.f32 %v2109_v63, %v1021_v49  ;;  %v2849_v63 = vld [vmem:[#allocation9 + $0x30] ss:$8 sps:$4 sm:$0xff]  }
 0x8d9   : > { %v1085_v21 = vmul.f32 %v1084_v1, %v1076_v0  ;;  %v2852_v0 = vld [vmem:[#allocation9 + $0x24] ss:$8 sps:$4 sm:$0xff]   ;;  %v2855_v1 = vld [vmem:[#allocation9 + $0x20] ss:$8 sps:$4 sm:$0xff]  }
 0x8db   : > { %v1086_v22 = vadd.f32 %v1085_v21, %v1083_v20  ;;  %v2861_v20 = vld [vmem:[#allocation9 + $0x10] ss:$8 sps:$4 sm:$0xff]   ;;  %v2864_v21 = vld [vmem:[#allocation9 + $0x4] ss:$8 sps:$4 sm:$0xff]  }
 0x8dd   : > { %v1096_v23 = vsel %vm1095_vm0, %v1021_v49, %v1086_v22  ;;  %v2867_v22 = vld [vmem:[#allocation9] ss:$8 sps:$4 sm:$0xff]  }
 0x8de   : > { %1901 = vst [vmem:[%s2500_s10 + $0x40] sm:$0xff] %v1096_v23  ;;  %vm1097_vm1 = vcmp.ge.f32.partialorder %v1096_v23, 0.0 }
 0x8df   : > { %v1899_v24 = vsel %vm1097_vm1, 1.0, %v2338_v40 }
 0x8e0   : > { %v1100_v25 = vmul.f32 %v1899_v24, %v1898_v2  ;;  %v2858_v2 = vld [vmem:[#allocation9 + $0x14] ss:$8 sps:$4 sm:$0xff]  }
 0x8e2   : > { %1900 = vst [vmem:[%s2498_s29 + $0x40] sm:$0xff] %v1100_v25  ;;  %v1105_v26 = vpack.c.bf16 %v1100_v25, %v1100_v25 }
 0x8e4   : > { %1142 = vmatmul.mubr.bf16.vlgmr.msra.gmra.mxu1 %v1105_v26 }
 0x8e5   : > { %1260 = vmatpush1.bf16.msra.mxu1 %v2506_v4  ;;  %1291 = vmatprep.mubr.bf16.mxu1 %v2337_v5  ;;  %v1902_v4 = vld [vmem:[%s2496_s28 + $0x90] sm:$0xff] }
 0x8e6   : > { %1261 = vmatprep.subr.bf16.mxu1 %v2511_v6 }
 0x8e9   : > { %1262 = vmatpush1.bf16.msra.mxu1 %v2515_v7 }
 0x8ea   : > { %1263 = vmatprep.subr.bf16.mxu1 %v2519_v8 }
 0x8ed   : > { %1264 = vmatpush1.bf16.msra.mxu1 %v2523_v9 }
 0x8ee   : > { %1265 = vmatprep.subr.bf16.mxu1 %v2527_v10 }
 0x8f1   : > { %1266 = vmatpush1.bf16.msra.mxu1 %v2531_v11 }
 0x8f2   : > { %1267 = vmatprep.subr.bf16.mxu1 %v2535_v12 }
 0x8f5   : > { %1268 = vmatpush1.bf16.msra.mxu1 %v2539_v13 }
 0x8f6   : > { %1269 = vmatprep.subr.bf16.mxu1 %v2543_v14 }
 0x8f9   : > { %1270 = vmatpush1.bf16.msra.mxu1 %v2547_v15 }
 0x8fa   : > { %1271 = vmatprep.subr.bf16.mxu1 %v2551_v16 }
 0x8fd   : > { %1272 = vmatpush1.bf16.msra.mxu1 %v2555_v17 }
 0x8fe   : > { %1273 = vmatprep.subr.bf16.mxu1 %v2559_v18 }
 0x901   : > { %1274 = vmatpush1.bf16.msra.mxu1 %v2563_v19 }
 0x902   : > { %1409 = vmatprep.subr.bf16.mxu1 %v2504_v3 }
 0x9a4   : > { %v1143_v6 = vpop.f32.mrf.mxu1 }
 0x9a5   : > { %v1150_v7 = vadd.f32 %v1902_v4, %v1143_v6 }
 0x9a6   : > { %v1145_v27 = vpop.f32.mrf.mxu1 }
 0x9a7   : > { %v1904_v28 = vmul.f32 -1.442695, %v1150_v7  ;;  %v1151_v35 = vadd.f32 %v1903_v33, %v1145_v27  ;;  %v1922_v33 = vld [vmem:[%s2491_s19 + $0xb] ss:$0 sm:$0xff] }
 0x9a8   : > { %v1147_v29 = vpop.f32.mrf.mxu1  ;;  %vm1320_vm6 = vcmp.eq.f32.partialorder %v1922_v33, 0.0 }
 0x9a9   : > { %2110 = vpow2.f32 %v1904_v28  ;;  %v1919_v29 = vld [vmem:[%s2496_s28 + $0xb8] sm:$0xff] }
 0x9aa   : > { %v1148_v30 = vpop.f32.mrf.mxu1 }
 0x9b6   : > { %v2111_v31 = vpop.eup %2110 }
 0x9b7   : > { %v1155_v32 = vadd.f32 1.0, %v2111_v31 }
 0x9b9   : > { %2112 = vrcp.f32 %v1155_v32 }
 0x9c6   : > { %v2113_v34 = vpop.eup %2112 }
 0x9c7   : > { %v1159_v36 = vsub.f32 1.0, %v2113_v34  ;;  %v1158_v3 = vmul.f32 %v2113_v34, %v1096_v23 }
 0x9c9   : > { %v1160_v38 = vmul.f32 %v1159_v36, %v1151_v35 }
 0x9cb   : > { %v1161_v39 = vadd.f32 %v1160_v38, %v1158_v3 }
 0x9cd   : > { %v1171_v41 = vsel %vm1170_vm2, %v1096_v23, %v1161_v39  ;;  %v1918_v23 = vld [vmem:[%s2496_s28 + $0xb0] sm:$0xff] }
 0x9ce   : > { %1909 = vst [vmem:[%s2500_s10 + $0x48] sm:$0xff] %v1171_v41  ;;  %vm1172_vm3 = vcmp.ge.f32.partialorder %v1171_v41, 0.0 }
 0x9cf   : > { %v1907_v42 = vsel %vm1172_vm3, 1.0, %v2338_v40 }
 0x9d0   : > { %v1175_v43 = vmul.f32 %v1907_v42, %v1906_v37 }
 0x9d2   : > { %1908 = vst [vmem:[%s2498_s29 + $0x48] sm:$0xff] %v1175_v43  ;;  %v1180_v44 = vpack.c.bf16 %v1175_v43, %v1175_v43 }
 0x9d4   : > { %1217 = vmatmul.mubr.bf16.vlgmr.msra.gmra.mxu0 %v1180_v44 }
 0x9d5   : > { %1335 = vmatpush1.bf16.msra.mxu0 %v2802_v45  ;;  %1366 = vmatprep.mubr.bf16.mxu0 %v2337_v5 }
 0x9d6   : > { %1336 = vmatprep.subr.bf16.mxu0 %v2806_v46 }
 0x9d9   : > { %1337 = vmatpush1.bf16.msra.mxu0 %v2809_v47 }
 0x9da   : > { %1338 = vmatprep.subr.bf16.mxu0 %v2519_v8  ;;  %v2141_v8 = vld [vmem:[#allocation9 + $0x74] ss:$8 sps:$4 sm:$0xff]  }
 0x9dd   : > { %1339 = vmatpush1.bf16.msra.mxu0 %v2523_v9  ;;  %v1910_v9 = vld [vmem:[%s2496_s28 + $0xa0] sm:$0xff] }
 0x9de   : > { %1340 = vmatprep.subr.bf16.mxu0 %v2527_v10 }
 0x9e1   : > { %1341 = vmatpush1.bf16.msra.mxu0 %v2531_v11 }
 0x9e2   : > { %1342 = vmatprep.subr.bf16.mxu0 %v2535_v12 }
 0x9e5   : > { %1343 = vmatpush1.bf16.msra.mxu0 %v2539_v13 }
 0x9e6   : > { %1344 = vmatprep.subr.bf16.mxu0 %v2543_v14 }
 0x9e9   : > { %1345 = vmatpush1.bf16.msra.mxu0 %v2547_v15 }
 0x9ea   : > { %1346 = vmatprep.subr.bf16.mxu0 %v2551_v16 }
 0x9ed   : > { %1347 = vmatpush1.bf16.msra.mxu0 %v2555_v17  ;;  %v1911_v17 = vld [vmem:[%s2496_s28 + $0xa8] sm:$0xff] }
 0x9ee   : > { %1348 = vmatprep.subr.bf16.mxu0 %v2559_v18 }
 0x9f1   : > { %1349 = vmatpush1.bf16.msra.mxu0 %v2563_v19 }
 0x9f2   : > { %1484 = vmatprep.subr.bf16.mxu0 %v2141_v8 }
 0xa94   : > { %v1218_v10 = vpop.f32.mrf.mxu0 }
 0xa95   : > { %v1225_v11 = vadd.f32 %v1910_v9, %v1218_v10 }
 0xa96   : > { %v1220_v12 = vpop.f32.mrf.mxu0 }
 0xa97   : > { %v1912_v13 = vmul.f32 -1.442695, %v1225_v11  ;;  %v1226_v49 = vadd.f32 %v1911_v17, %v1220_v12 }
 0xa98   : > { %v1222_v14 = vpop.f32.mrf.mxu0 }
 0xa99   : > { %2114 = vpow2.f32 %v1912_v13  ;;  %v1927_v13 = vld [vmem:[%s2496_s28 + $0xc8] sm:$0xff] }
 0xa9a   : > { %v1223_v15 = vpop.f32.mrf.mxu0 }
 0xaa6   : > { %v2115_v16 = vpop.eup %2114 }
 0xaa7   : > { %v1230_v48 = vadd.f32 1.0, %v2115_v16 }
 0xaa9   : > { %2116 = vrcp.f32 %v1230_v48  ;;  %v1930_v48 = vld [vmem:[%s2491_s19 + $0xc] ss:$0 sm:$0xff] }
 0xaaa   : > { %vm1395_vm8 = vcmp.eq.f32.partialorder %v1930_v48, 0.0 }
 0xab6   : > { %v2117_v18 = vpop.eup %2116 }
 0xab7   : > { %v1234_v19 = vsub.f32 1.0, %v2117_v18  ;;  %v1233_v51 = vmul.f32 %v2117_v18, %v1171_v41 }
 0xab9   : > { %v1235_v52 = vmul.f32 %v1234_v19, %v1226_v49 }
 0xabb   : > { %v1236_v53 = vadd.f32 %v1235_v52, %v1233_v51 }
 0xabd   : > { %v1246_v54 = vsel %vm1245_vm4, %v1171_v41, %v1236_v53  ;;  %v1926_v41 = vld [vmem:[%s2496_s28 + $0xc0] sm:$0xff] }
 0xabe   : > { %1917 = vst [vmem:[%s2500_s10 + $0x50] sm:$0xff] %v1246_v54  ;;  %vm1247_vm5 = vcmp.ge.f32.partialorder %v1246_v54, 0.0 }
 0xabf   : > { %v1915_v55 = vsel %vm1247_vm5, 1.0, %v2338_v40 }
 0xac0   : > { %v1250_v56 = vmul.f32 %v1915_v55, %v1914_v50 }
 0xac2   : > { %1916 = vst [vmem:[%s2498_s29 + $0x50] sm:$0xff] %v1250_v56  ;;  %v1255_v57 = vpack.c.bf16 %v1250_v56, %v1250_v56 }
 0xac4   : > { %1292 = vmatmul.mubr.bf16.vlgmr.msra.gmra.mxu1 %v1255_v57 }
 0xac5   : > { %1410 = vmatpush1.bf16.msra.mxu1 %v2802_v45  ;;  %1441 = vmatprep.mubr.bf16.mxu1 %v2337_v5 }
 0xac6   : > { %1411 = vmatprep.subr.bf16.mxu1 %v2806_v46 }
 0xac9   : > { %1412 = vmatpush1.bf16.msra.mxu1 %v2809_v47 }
 0xaca   : > { %1413 = vmatprep.subr.bf16.mxu1 %v2834_v58 }
 0xacd   : > { %1414 = vmatpush1.bf16.msra.mxu1 %v2837_v59 }
 0xace   : > { %1415 = vmatprep.subr.bf16.mxu1 %v2840_v60 }
 0xad1   : > { %1416 = vmatpush1.bf16.msra.mxu1 %v2843_v61 }
 0xad2   : > { %1417 = vmatprep.subr.bf16.mxu1 %v2846_v62 }
 0xad5   : > { %1418 = vmatpush1.bf16.msra.mxu1 %v2849_v63 }
 0xad6   : > { %1419 = vmatprep.subr.bf16.mxu1 %v2852_v0 }
 0xad9   : > { %1420 = vmatpush1.bf16.msra.mxu1 %v2855_v1 }
 0xada   : > { %1421 = vmatprep.subr.bf16.mxu1 %v2858_v2 }
 0xadd   : > { %1422 = vmatpush1.bf16.msra.mxu1 %v2861_v20 }
 0xade   : > { %1423 = vmatprep.subr.bf16.mxu1 %v2864_v21 }
 0xae1   : > { %1424 = vmatpush1.bf16.msra.mxu1 %v2867_v22 }
 0xae2   : > { %1559 = vmatprep.subr.bf16.mxu1 %v2141_v8 }
 0xb84   : > { %v1293_v24 = vpop.f32.mrf.mxu1 }
 0xb85   : > { %v1300_v25 = vadd.f32 %v1918_v23, %v1293_v24  ;;  %v1942_v23 = vld [vmem:[%s2496_s28 + $0xe0] sm:$0xff] }
 0xb86   : > { %v1295_v26 = vpop.f32.mrf.mxu1 }
 0xb87   : > { %v1920_v4 = vmul.f32 -1.442695, %v1300_v25  ;;  %v1301_v31 = vadd.f32 %v1919_v29, %v1295_v26  ;;  %v1943_v29 = vld [vmem:[%s2496_s28 + $0xe8] sm:$0xff] }
 0xb88   : > { %v1297_v6 = vpop.f32.mrf.mxu1 }
 0xb89   : > { %2118 = vpow2.f32 %v1920_v4 }
 0xb8a   : > { %v1298_v7 = vpop.f32.mrf.mxu1 }
 0xb96   : > { %v2119_v27 = vpop.eup %2118 }
 0xb97   : > { %v1305_v28 = vadd.f32 1.0, %v2119_v27 }
 0xb99   : > { %2120 = vrcp.f32 %v1305_v28 }
 0xba6   : > { %v2121_v30 = vpop.eup %2120 }
 0xba7   : > { %v1309_v32 = vsub.f32 1.0, %v2121_v30  ;;  %v1308_v34 = vmul.f32 %v2121_v30, %v1246_v54 }
 0xba9   : > { %v1310_v35 = vmul.f32 %v1309_v32, %v1301_v31 }
 0xbab   : > { %v1311_v36 = vadd.f32 %v1310_v35, %v1308_v34 }
 0xbad   : > { %v1321_v37 = vsel %vm1320_vm6, %v1246_v54, %v1311_v36 }
 0xbae   : > { %1925 = vst [vmem:[%s2500_s10 + $0x58] sm:$0xff] %v1321_v37  ;;  %vm1322_vm7 = vcmp.ge.f32.partialorder %v1321_v37, 0.0 }
 0xbaf   : > { %v1923_v3 = vsel %vm1322_vm7, 1.0, %v2338_v40 }
 0xbb0   : > { %v1325_v38 = vmul.f32 %v1923_v3, %v1922_v33  ;;  %v1946_v33 = vld [vmem:[%s2491_s19 + $0xe] ss:$0 sm:$0xff] }
 0xbb1   : > { %vm1545_vm12 = vcmp.eq.f32.partialorder %v1946_v33, 0.0 }
 0xbb2   : > { %1924 = vst [vmem:[%s2498_s29 + $0x58] sm:$0xff] %v1325_v38  ;;  %v1330_v39 = vpack.c.bf16 %v1325_v38, %v1325_v38 }
 0xbb4   : > { %1367 = vmatmul.mubr.bf16.vlgmr.msra.gmra.mxu0 %v1330_v39 }
 0xbb5   : > { %1485 = vmatpush1.bf16.msra.mxu0 %v2802_v45  ;;  %1516 = vmatprep.mubr.bf16.mxu0 %v2337_v5 }
 0xbb6   : > { %1486 = vmatprep.subr.bf16.mxu0 %v2806_v46 }
 0xbb9   : > { %1487 = vmatpush1.bf16.msra.mxu0 %v2809_v47 }
 0xbba   : > { %1488 = vmatprep.subr.bf16.mxu0 %v2834_v58 }
 0xbbd   : > { %1489 = vmatpush1.bf16.msra.mxu0 %v2837_v59 }
 0xbbe   : > { %1490 = vmatprep.subr.bf16.mxu0 %v2840_v60 }
 0xbc1   : > { %1491 = vmatpush1.bf16.msra.mxu0 %v2843_v61 }
 0xbc2   : > { %1492 = vmatprep.subr.bf16.mxu0 %v2846_v62 }
 0xbc5   : > { %1493 = vmatpush1.bf16.msra.mxu0 %v2849_v63 }
 0xbc6   : > { %1494 = vmatprep.subr.bf16.mxu0 %v2852_v0 }
 0xbc9   : > { %1495 = vmatpush1.bf16.msra.mxu0 %v2855_v1 }
 0xbca   : > { %1496 = vmatprep.subr.bf16.mxu0 %v2858_v2 }
 0xbcd   : > { %1497 = vmatpush1.bf16.msra.mxu0 %v2861_v20 }
 0xbce   : > { %1498 = vmatprep.subr.bf16.mxu0 %v2864_v21 }
 0xbd1   : > { %1499 = vmatpush1.bf16.msra.mxu0 %v2867_v22 }
 0xc74   : > { %v1368_v42 = vpop.f32.mrf.mxu0 }
 0xc75   : > { %v1375_v43 = vadd.f32 %v1926_v41, %v1368_v42  ;;  %v1950_v41 = vld [vmem:[%s2496_s28 + $0xf0] sm:$0xff] }
 0xc76   : > { %v1370_v44 = vpop.f32.mrf.mxu0 }
 0xc77   : > { %v1928_v8 = vmul.f32 -1.442695, %v1375_v43  ;;  %v1376_v15 = vadd.f32 %v1927_v13, %v1370_v44  ;;  %v1951_v13 = vld [vmem:[%s2496_s28 + $0xf8] sm:$0xff] }
 0xc78   : > { %v1372_v9 = vpop.f32.mrf.mxu0 }
 0xc79   : > { %2122 = vpow2.f32 %v1928_v8 }
 0xc7a   : > { %v1373_v10 = vpop.f32.mrf.mxu0 }
 0xc86   : > { %v2123_v11 = vpop.eup %2122 }
 0xc87   : > { %v1380_v12 = vadd.f32 1.0, %v2123_v11 }
 0xc89   : > { %2124 = vrcp.f32 %v1380_v12 }
 0xc96   : > { %v2125_v14 = vpop.eup %2124 }
 0xc97   : > { %v1384_v16 = vsub.f32 1.0, %v2125_v14  ;;  %v1383_v17 = vmul.f32 %v2125_v14, %v1321_v37 }
 0xc99   : > { %v1385_v18 = vmul.f32 %v1384_v16, %v1376_v15 }
 0xc9b   : > { %v1386_v49 = vadd.f32 %v1385_v18, %v1383_v17 }
 0xc9d   : > { %v1396_v19 = vsel %vm1395_vm8, %v1321_v37, %v1386_v49 }
 0xc9e   : > { %1933 = vst [vmem:[%s2500_s10 + $0x60] sm:$0xff] %v1396_v19  ;;  %vm1397_vm9 = vcmp.ge.f32.partialorder %v1396_v19, 0.0 }
 0xc9f   : > { %v1931_v50 = vsel %vm1397_vm9, 1.0, %v2338_v40 }
 0xca0   : > { %v1400_v51 = vmul.f32 %v1931_v50, %v1930_v48  ;;  %v1954_v48 = vld [vmem:[%s2491_s19 + $0xf] ss:$0 sm:$0xff] }
 0xca1   : > { %vm1620_vm14 = vcmp.eq.f32.partialorder %v1954_v48, 0.0 }
 0xca2   : > { %1932 = vst [vmem:[%s2498_s29 + $0x60] sm:$0xff] %v1400_v51  ;;  %v1405_v52 = vpack.c.bf16 %v1400_v51, %v1400_v51 }
 0xca4   : > { %1442 = vmatmul.mubr.bf16.vlgmr.msra.gmra.mxu1 %v1405_v52 }
 0xca5   : > { %1560 = vmatpush1.bf16.msra.mxu1 %v2802_v45  ;;  %1591 = vmatprep.mubr.bf16.mxu1 %v2337_v5  ;;  %v1934_v5 = vld [vmem:[%s2496_s28 + $0xd0] sm:$0xff] }
 0xca6   : > { %1561 = vmatprep.subr.bf16.mxu1 %v2806_v46 }
 0xca9   : > { %1562 = vmatpush1.bf16.msra.mxu1 %v2809_v47 }
 0xcaa   : > { %1563 = vmatprep.subr.bf16.mxu1 %v2834_v58  ;;  %v1935_v58 = vld [vmem:[%s2496_s28 + $0xd8] sm:$0xff] }
 0xcad   : > { %1564 = vmatpush1.bf16.msra.mxu1 %v2837_v59 }
 0xcae   : > { %1565 = vmatprep.subr.bf16.mxu1 %v2840_v60 }
 0xcb1   : > { %1566 = vmatpush1.bf16.msra.mxu1 %v2843_v61 }
 0xcb2   : > { %1567 = vmatprep.subr.bf16.mxu1 %v2846_v62  ;;  %v1938_v62 = vld [vmem:[%s2491_s19 + $0xd] ss:$0 sm:$0xff]  ;;  %s2339_s19 = smov [#allocation11]  }
 0xcb3   : > { %vm1470_vm10 = vcmp.eq.f32.partialorder %v1938_v62, 0.0  ;;  %s2236_s20 = sshll.u32 %s2339_s19, 4  ;;  %s2237_s20 = int_to_ptr.vmem [resolvable:$false] %s2236_s20 }
 0xcb4   : > { %s2238_s26 = scalar_lea.vmem %s2237_s20, 4096  ;;  %p2239_p5 = scmp.lt.s32.totalorder %s2938_s12, %s2237_s20 }
 0xcb5   : > { %1568 = vmatpush1.bf16.msra.mxu1 %v2849_v63  ;;  %p2240_p6 = scmp.lt.s32.totalorder %s2238_s26, %s2232_s18 }
 0xcb6   : > { %1569 = vmatprep.subr.bf16.mxu1 %v2852_v0 }
 0xcb7   : > { %p2241_p11 = por %p2240_p6, %p2239_p5 }
 0xcb9   : > { %1570 = vmatpush1.bf16.msra.mxu1 %v2855_v1  ;;  %p2242_p7 = pnand %p2241_p11, %p2235_p4 }
 0xcba   : > { %1571 = vmatprep.subr.bf16.mxu1 %v2858_v2 }
 0xcbd   : > { %1572 = vmatpush1.bf16.msra.mxu1 %v2861_v20 }
 0xcbe   : > { %1573 = vmatprep.subr.bf16.mxu1 %v2864_v21 }
 0xcc1   : > { %1574 = vmatpush1.bf16.msra.mxu1 %v2867_v22 }
 0xd64   : > { %v1443_v45 = vpop.f32.mrf.mxu1 }
 0xd65   : > { %v1450_v46 = vadd.f32 %v1934_v5, %v1443_v45 }
 0xd66   : > { %v1445_v47 = vpop.f32.mrf.mxu1 }
 0xd67   : > { %v1936_v53 = vmul.f32 -1.442695, %v1450_v46  ;;  %v1451_v60 = vadd.f32 %v1935_v58, %v1445_v47 }
 0xd68   : > { %v1447_v54 = vpop.f32.mrf.mxu1 }
 0xd69   : > { %2126 = vpow2.f32 %v1936_v53 }
 0xd6a   : > { %v1448_v55 = vpop.f32.mrf.mxu1 }
 0xd76   : > { %v2127_v56 = vpop.eup %2126 }
 0xd77   : > { %v1455_v57 = vadd.f32 1.0, %v2127_v56 }
 0xd79   : > { %2128 = vrcp.f32 %v1455_v57 }
 0xd86   : > { %v2129_v59 = vpop.eup %2128 }
 0xd87   : > { %v1459_v61 = vsub.f32 1.0, %v2129_v59  ;;  %v1458_v63 = vmul.f32 %v2129_v59, %v1396_v19 }
 0xd89   : > { %v1460_v0 = vmul.f32 %v1459_v61, %v1451_v60 }
 0xd8b   : > { %v1461_v1 = vadd.f32 %v1460_v0, %v1458_v63 }
 0xd8d   : > { %v1471_v2 = vsel %vm1470_vm10, %v1396_v19, %v1461_v1 }
 0xd8e   : > { %1941 = vst [vmem:[%s2500_s10 + $0x68] sm:$0xff] %v1471_v2  ;;  %vm1472_vm11 = vcmp.ge.f32.partialorder %v1471_v2, 0.0 }
 0xd8f   : > { %v1939_v20 = vsel %vm1472_vm11, 1.0, %v2338_v40 }
 0xd90   : > { %v1475_v21 = vmul.f32 %v1939_v20, %v1938_v62 }
 0xd92   : > { %1940 = vst [vmem:[%s2498_s29 + $0x68] sm:$0xff] %v1475_v21  ;;  %v1480_v22 = vpack.c.bf16 %v1475_v21, %v1475_v21 }
 0xd94   : > { %1517 = vmatmul.mubr.bf16.vlgmr.msra.gmra.mxu0 %v1480_v22 }
 0xe54   : > { %v1518_v24 = vpop.f32.mrf.mxu0 }
 0xe55   : > { %v1525_v25 = vadd.f32 %v1942_v23, %v1518_v24 }
 0xe56   : > { %v1520_v26 = vpop.f32.mrf.mxu0 }
 0xe57   : > { %v1944_v4 = vmul.f32 -1.442695, %v1525_v25  ;;  %v1526_v31 = vadd.f32 %v1943_v29, %v1520_v26 }
 0xe58   : > { %v1522_v6 = vpop.f32.mrf.mxu0 }
 0xe59   : > { %2130 = vpow2.f32 %v1944_v4 }
 0xe5a   : > { %v1523_v7 = vpop.f32.mrf.mxu0 }
 0xe66   : > { %v2131_v27 = vpop.eup %2130 }
 0xe67   : > { %v1530_v28 = vadd.f32 1.0, %v2131_v27 }
 0xe69   : > { %2132 = vrcp.f32 %v1530_v28 }
 0xe76   : > { %v2133_v30 = vpop.eup %2132 }
 0xe77   : > { %v1534_v32 = vsub.f32 1.0, %v2133_v30  ;;  %v1533_v34 = vmul.f32 %v2133_v30, %v1471_v2 }
 0xe79   : > { %v1535_v35 = vmul.f32 %v1534_v32, %v1526_v31 }
 0xe7b   : > { %v1536_v36 = vadd.f32 %v1535_v35, %v1533_v34 }
 0xe7d   : > { %v1546_v37 = vsel %vm1545_vm12, %v1471_v2, %v1536_v36 }
 0xe7e   : > { %1949 = vst [vmem:[%s2500_s10 + $0x70] sm:$0xff] %v1546_v37  ;;  %vm1547_vm13 = vcmp.ge.f32.partialorder %v1546_v37, 0.0 }
 0xe7f   : > { %v1947_v3 = vsel %vm1547_vm13, 1.0, %v2338_v40 }
 0xe80   : > { %v1550_v38 = vmul.f32 %v1947_v3, %v1946_v33 }
 0xe82   : > { %1948 = vst [vmem:[%s2498_s29 + $0x70] sm:$0xff] %v1550_v38  ;;  %v1555_v39 = vpack.c.bf16 %v1550_v38, %v1550_v38 }
 0xe84   : > { %1592 = vmatmul.mubr.bf16.vlgmr.msra.gmra.mxu1 %v1555_v39 }
 0xf44   : > { %v1593_v42 = vpop.f32.mrf.mxu1 }
 0xf45   : > { %v1600_v43 = vadd.f32 %v1950_v41, %v1593_v42 }
 0xf46   : > { %v1595_v44 = vpop.f32.mrf.mxu1 }
 0xf47   : > { %v1952_v8 = vmul.f32 -1.442695, %v1600_v43  ;;  %v1601_v15 = vadd.f32 %v1951_v13, %v1595_v44 }
 0xf48   : > { %v1597_v9 = vpop.f32.mrf.mxu1 }
 0xf49   : > { %2134 = vpow2.f32 %v1952_v8 }
 0xf4a   : > { %v1598_v10 = vpop.f32.mrf.mxu1 }
 0xf56   : > { %v2135_v11 = vpop.eup %2134 }
 0xf57   : > { %v1605_v12 = vadd.f32 1.0, %v2135_v11 }
 0xf59   : > { %2136 = vrcp.f32 %v1605_v12 }
 0xf66   : > { %v2137_v14 = vpop.eup %2136 }
 0xf67   : > { %v1609_v16 = vsub.f32 1.0, %v2137_v14  ;;  %v1608_v17 = vmul.f32 %v2137_v14, %v1546_v37 }
 0xf69   : > { %v1610_v18 = vmul.f32 %v1609_v16, %v1601_v15 }
 0xf6b   : > { %v1611_v49 = vadd.f32 %v1610_v18, %v1608_v17 }
 0xf6d   : > { %v1621_v19 = vsel %vm1620_vm14, %v1546_v37, %v1611_v49 }
 0xf6e   : > { %vm1622_vm15 = vcmp.ge.f32.partialorder %v1621_v19, 0.0  ;;  %1957 = vst [vmem:[%s2500_s10 + $0x78] sm:$0xff] %v1621_v19  ;;  %1632 = vst [vmem:[#allocation3] sm:$0xff] %v1621_v19 }
 0xf6f   : > { %v1955_v50 = vsel %vm1622_vm15, 1.0, %v2338_v40 }
 0xf70   : > { %2245 = shalt.err (!%p2242_p7)
}
 0xf71   : > { %s2246_s28 = scalar_lea.hbm %s2936_s9, 2048  ;;  %s2250_s14 = scalar_lea.hbm %s3028_s6, 4096 }
 0xf72   : > { %p2247_p0 = scmp.ne.s32.totalorder %s2936_s9, %s2246_s28  ;;  %p2251_p1 = scmp.lt.s32.totalorder %s2936_s9, %s3028_s6 }
 0xf73   : > { %p2252_p13 = scmp.lt.s32.totalorder %s2250_s14, %s2246_s28 }
 0xf74   : > { %p2248_p8 = pnand %p2247_p0, %p3042_p9 }
 0xf75   : > { %p2253_p2 = por %p2252_p13, %p2251_p1 }
 0xf76   : > { %p2249_p12 = pneg %p2248_p8 }
 0xf78   : > { %p2254_p3 = pnand %p2253_p2, %p2249_p12 }
 0xf7a   : > { %2257 = shalt.err (!%p2254_p3)
}
 0xf7b   : > { %s2340_s18 = smov 128   ;;  %s2341_s20 = smov 8   ;;  %v1625_v40 = vmul.f32 %v1955_v50, %v1954_v48 }
 0xf7c   : > { %1982 = dma.vmem_to_hbm [thread:$0]  (%p3042_p9), %s2938_s12, 2048, %s2936_s9, %s1639_s17, %s2340_s18, %s2340_s18, %s2341_s20  }
 0xf7d   : > { %s2974_s28 = scalar_lea.hbm %s3027_s5, %s1967_s11  ;;  %s3043_s10 = sshll.u32 %s2498_s29, 4  ;;  %1956 = vst [vmem:[%s2498_s29 + $0x78] sm:$0xff] %v1625_v40  ;;  %v1630_v51 = vpack.c.bf16 %v1625_v40, %v1625_v40  ;;  %s2978_s10 = int_to_ptr.vmem [resolvable:$true] %s3043_s10 }
 0xf7e   : > { %s1634_s15 = scalar_lea.sflag [#allocation6], %s2484_s13  ;;  %s2258_s14 = scalar_lea.vmem %s2978_s10, 2048 }
 0xf7f   : > { %p2259_p10 = scmp.ne.s32.totalorder %s2978_s10, %s2258_s14  ;;  %s2342_s25 = smov [#allocation10]  }
 0xf80   : > { %s2262_s12 = sshll.u32 %s2342_s25, 4  ;;  %s2263_s12 = int_to_ptr.vmem [resolvable:$false] %s2262_s12 }
 0xf81   : > { %p2260_p4 = pnand %p2259_p10, %p3042_p9  ;;  %s2264_s9 = scalar_lea.vmem %s2263_s12, 4096 }
 0xf82   : > { %p2265_p6 = scmp.lt.s32.totalorder %s2978_s10, %s2263_s12  ;;  %p2266_p11 = scmp.lt.s32.totalorder %s2264_s9, %s2258_s14 }
 0xf83   : > { %p2261_p5 = pneg %p2260_p4 }
 0xf84   : > { %p2267_p7 = por %p2266_p11, %p2265_p6 }
 0xf86   : > { %p2268_p0 = pnand %p2267_p7, %p2261_p5 }
 0xf88   : > { %2271 = shalt.err (!%p2268_p0)
}
 0xf89   : > { %s2272_s29 = scalar_lea.hbm %s2974_s28, 2048  ;;  %s2276_s17 = scalar_lea.hbm %s3027_s5, 4096 }
 0xf8a   : > { %p2273_p8 = scmp.ne.s32.totalorder %s2974_s28, %s2272_s29  ;;  %p2277_p13 = scmp.lt.s32.totalorder %s2974_s28, %s3027_s5 }
 0xf8b   : > { %p2278_p2 = scmp.lt.s32.totalorder %s2276_s17, %s2272_s29 }
 0xf8c   : > { %p2274_p12 = pnand %p2273_p8, %p3042_p9 }
 0xf8d   : > { %p2279_p3 = por %p2278_p2, %p2277_p13 }
 0xf8e   : > { %p2275_p1 = pneg %p2274_p12 }
 0xf90   : > { %p2280_p10 = pnand %p2279_p3, %p2275_p1 }
 0xf92   : > { %2283 = shalt.err (!%p2280_p10)
}
 0xf93   : > { %1981 = dma.vmem_to_hbm [thread:$0]  (%p3042_p9), %s2978_s10, 2048, %s2974_s28, %s1634_s15, %s2340_s18, %s2340_s18, %s2341_s20   ;;  %1631 = vst [vmem:[#allocation2] sm:$0xf] %v1630_v51 }
 0xf94 PF: > { %p2008_p4 = scmp.ge.s32.totalorder %s2330_s24, 2  ;;  %s1683_s26 = sand.u32 1, %s2318_s21  }
 0xf95   : > { %p3044_p5 = scmp.ne.s32.totalorder %s3033_s8, 0  ;;  %s1684_s14 = scalar_lea.sflag [#allocation6], %s1683_s26 }
 0xf97   : > { %p1996_p6 = pnand %p2008_p4, %p3044_p5 }
 0xf99   : > { %p1997_p11 = pneg %p1996_p6 }
 0xf9b   : > { %2309 = dma.done.wait (%p1997_p11), %s1684_s14, 2048  }
 0xf9c   : > { %2311 = vsyncadd (%p1997_p11), %s1684_s14, 4294965248  ;;  %s1693_s7 = scalar_lea.sflag [#allocation12], %s1683_s26 }
 0xf9d   : > { %2313 = dma.done.wait (%p1997_p11), %s1693_s7, 2048  }
 0xf9e   : > { %2315 = vsyncadd (%p1997_p11), %s1693_s7, 4294965248  ;;  %p22_p9 = scmp.ge.s32.totalorder %s2403_s27, 4   ;;  %s3045_s21 = smov %s2322_s22 }
 0xf9f   : > { %s3046_s22 = smov %s2326_s23  ;;  %s3047_s23 = smov %s2414_s30 }
 0xfa0   : > { %s3048_s24 = smov %s2403_s27  ;;  %24 = sbr.rel (!%p22_p9) target bundleno = 7 (0x7), region = 172 }
 0xfa5   :  { %1698 = vsyncpa [#allocation5], 1 }
 0xfa6   :  { %1700 = vsyncpa [#allocation5 + $0x1], 1 }
 0xfa7   :  { %1701 = vsyncpa [#allocation8], 1 }
 0xfa8   :  { %1702 = vsyncpa [#allocation6], 1 }
 0xfa9   :  { %1704 = vsyncpa [#allocation6 + $0x1], 1 }
 0xfaa   :  { %1705 = vsyncpa [#allocation12], 1 }
 0xfab   :  { %1707 = vsyncpa [#allocation12 + $0x1], 1 }

</bundles_post_ra>
